<compile_context>
chip_gen: v7x
topology: tpu7x:2x2x1
jax: 0.10.0
libtpu: 0.0.40
codegen_flags: <defaults>
</compile_context>

<pallas_src>
import functools

import jax
import jax.numpy as jnp
from jax import lax
from jax.experimental import pallas as pl
from jax.experimental.pallas import tpu as pltpu


def _lstm_pred_kernel(x_ref,                        # (T*B, D)   bf16, time-major
                      wih0_ref, whh0_ref,           # (D,4H) (H,4H)  bf16
                      wih1_ref, whh1_ref,           # (H,4H) (H,4H)  bf16
                      b0_ref, b1_ref,               # (1,4H) (1,4H)  f32
                      wdec_ref, bdec_ref,           # (H,O) bf16, (1,O) f32
                      out_ref,                      # (B, O)     f32
                      *, batch, seq):
    B, T = batch, seq
    H = whh0_ref.shape[0]
    G = 4 * H
    f32 = jnp.float32
    bf16 = jnp.bfloat16

    # ---- Hoisted layer-0 input projection, bias b0 folded in, kept in vregs:
    # one (T*B, D) @ (D, 4H) bf16 matmul with f32 accumulation.
    xw = (jnp.dot(x_ref[...], wih0_ref[...], preferred_element_type=f32)
          + b0_ref[...]).reshape(T, B, G)

    # ---- Loop-invariant weight / bias hoists (JAX does not CSE broadcasts).
    whh0 = whh0_ref[...]
    whh1 = whh1_ref[...]
    wih1 = wih1_ref[...]
    b1 = jnp.broadcast_to(b1_ref[...], (B, G))

    # sigmoid(x) = 0.5*(1 + tanh(x/2)): pre-scale i/f/o lanes by 0.5, g lanes
    # by 1.0, then ONE tanh over the full (B, 4H) lane width per gate set.
    lane = lax.broadcasted_iota(jnp.int32, (1, G), 1)
    scale = jnp.where((lane >= 2 * H) & (lane < 3 * H), 1.0, 0.5).astype(f32)

    def gates_to_hc(gates, c):
        t = jnp.tanh(gates * scale)                  # single EUP op (full vreg)
        i = 0.5 + 0.5 * t[:, 0 * H:1 * H]            # VALU fma recoveries
        f = 0.5 + 0.5 * t[:, 1 * H:2 * H]
        g = t[:, 2 * H:3 * H]
        o = 0.5 + 0.5 * t[:, 3 * H:4 * H]
        c_new = f * c + i * g
        return o * jnp.tanh(c_new), c_new            # second EUP op

    z = jnp.zeros((B, H), f32)
    h1, c1, h2, c2 = z, z, z, z

    # Fully-unrolled static recurrence: static xw[t] slices, whole dependency
    # chain visible to the scheduler, no dynamic indexing, no VMEM scratch.
    for t in range(T):
        if t == 0:
            g1_rec = b1                              # h1 = h2 = 0 at t = 0
            g0 = xw[0]
        else:
            # Depends only on the previous step's h2 -> issues early, off the
            # h1 critical chain (concat-free split of the layer-1 matmul).
            g1_rec = jnp.dot(h2.astype(bf16), whh1,
                             preferred_element_type=f32) + b1
            g0 = xw[t] + jnp.dot(h1.astype(bf16), whh0,
                                 preferred_element_type=f32)
        h1, c1 = gates_to_hc(g0, c1)

        g1 = jnp.dot(h1.astype(bf16), wih1, preferred_element_type=f32) + g1_rec
        h2, c2 = gates_to_hc(g1, c2)

    # Decoder on the last timestep's hidden state.
    out_ref[...] = (jnp.dot(h2.astype(bf16), wdec_ref[...],
                            preferred_element_type=f32)
                    + bdec_ref[...]).astype(out_ref.dtype)


def lstm_pred(x, params):
    """x: (B, T, D) float32 (PyTorch batch_first). Returns (B, output_size)."""
    B, T, D = x.shape
    H = params["whh0"].shape[0]          # whh0 is (H, 4H)
    out_size = params["wdec"].shape[1]   # wdec is (H, output_size)
    bf16 = jnp.bfloat16

    # Layout plumbing outside the kernel: time-major (T*B, D), bf16 operands
    # for the MXU (accumulation stays f32 inside the kernel).
    x_tm = jnp.transpose(x, (1, 0, 2)).reshape(T * B, D).astype(bf16)

    vmem = pl.BlockSpec(memory_space=pltpu.MemorySpace.VMEM)

    return pl.pallas_call(
        functools.partial(_lstm_pred_kernel, batch=B, seq=T),
        out_shape=jax.ShapeDtypeStruct((B, out_size), jnp.float32),
        in_specs=[vmem] * 9,
        out_specs=vmem,
    )(x_tm,
      params["wih0"].astype(bf16), params["whh0"].astype(bf16),
      params["wih1"].astype(bf16), params["whh1"].astype(bf16),
      params["b0"], params["b1"],
      params["wdec"].astype(bf16), params["bdec"])


def init_params(key, input_size, hidden_size, output_size):
    """Deterministic init, PyTorch-style U(-1/sqrt(H), 1/sqrt(H)).

    Weights stored pre-transposed for (B, in) @ (in, 4H) matmuls, f32 master
    copies (the wrapper casts MXU operands to bf16).
    """
    k = 1.0 / jnp.sqrt(hidden_size)
    keys = jax.random.split(key, 10)
    u = lambda kk, shape: jax.random.uniform(kk, shape, jnp.float32, -k, k)
    H = hidden_size
    return {
        "wih0": u(keys[0], (input_size, 4 * H)),
        "whh0": u(keys[1], (H, 4 * H)),
        "b0": u(keys[2], (1, 4 * H)) + u(keys[3], (1, 4 * H)),   # b_ih + b_hh
        "wih1": u(keys[4], (H, 4 * H)),
        "whh1": u(keys[5], (H, 4 * H)),
        "b1": u(keys[6], (1, 4 * H)) + u(keys[7], (1, 4 * H)),
        "wdec": u(keys[8], (H, output_size)),
        "bdec": u(keys[9], (1, output_size)),
    }


def lstm_pred_ref(x, params):
    """Pure-JAX f32 reference (lax.scan) replicating PyTorch nn.LSTM semantics."""
    B, T, D = x.shape
    H = params["whh0"].shape[0]

    def cell(inp, h, c, wih, whh, b):
        gates = inp @ wih + h @ whh + b
        i = jax.nn.sigmoid(gates[:, 0 * H:1 * H])
        f = jax.nn.sigmoid(gates[:, 1 * H:2 * H])
        g = jnp.tanh(gates[:, 2 * H:3 * H])
        o = jax.nn.sigmoid(gates[:, 3 * H:4 * H])
        c_new = f * c + i * g
        return o * jnp.tanh(c_new), c_new

    def step(carry, x_t):
        h1, c1, h2, c2 = carry
        h1, c1 = cell(x_t, h1, c1, params["wih0"], params["whh0"], params["b0"])
        h2, c2 = cell(h1, h2, c2, params["wih1"], params["whh1"], params["b1"])
        return (h1, c1, h2, c2), h2

    z = jnp.zeros((B, H), jnp.float32)
    (_, _, h2, _), _ = lax.scan(step, (z, z, z, z), jnp.transpose(x, (1, 0, 2)))
    return h2 @ params["wdec"] + params["bdec"]


if __name__ == "__main__":
    # Small shapes consistent with the module:
    #   input_size=4, sequence_length=8, lstm_hidden_size=32, output_size=1
    B, T, D, H, O = 2, 8, 4, 32, 1

    key = jax.random.PRNGKey(0)
    kx, kp = jax.random.split(key)
    x = jax.random.normal(kx, (B, T, D), jnp.float32)
    params = init_params(kp, D, H, O)

    out = jax.block_until_ready(lstm_pred(x, params))
    ref = jax.block_until_ready(lstm_pred_ref(x, params))

    assert out.shape == (B, O), out.shape
    # bf16 MXU operands vs. the f32 reference -> loosened tolerance.
    assert jnp.allclose(out, ref, atol=2e-2, rtol=2e-2), (out, ref)
    print("KERNEL_OK")
</pallas_src>

<mosaic_0001>
module attributes {stable_mosaic.version = 11 : i64} {
  func.func @_lstm_pred_kernel(%arg0: memref<16x4xbf16, #tpu.memory_space<vmem>>, %arg1: memref<4x128xbf16, #tpu.memory_space<vmem>>, %arg2: memref<32x128xbf16, #tpu.memory_space<vmem>>, %arg3: memref<32x128xbf16, #tpu.memory_space<vmem>>, %arg4: memref<32x128xbf16, #tpu.memory_space<vmem>>, %arg5: memref<1x128xf32, #tpu.memory_space<vmem>>, %arg6: memref<1x128xf32, #tpu.memory_space<vmem>>, %arg7: memref<32x1xbf16, #tpu.memory_space<vmem>>, %arg8: memref<1x1xf32, #tpu.memory_space<vmem>>, %arg9: memref<2x1xf32, #tpu.memory_space<vmem>>) attributes {dimension_semantics = [], scalar_prefetch = 0 : i64, scratch_operands = 0 : i64, tpu.core_type = #tpu.core_type<tc>} {
    %c0 = arith.constant 0 : index
    %c0_0 = arith.constant 0 : index
    %0 = vector.load %arg0[%c0, %c0_0] : memref<16x4xbf16, #tpu.memory_space<vmem>>, vector<16x4xbf16>
    %c0_1 = arith.constant 0 : index
    %c0_2 = arith.constant 0 : index
    %1 = vector.load %arg1[%c0_1, %c0_2] : memref<4x128xbf16, #tpu.memory_space<vmem>>, vector<4x128xbf16>
    %cst = arith.constant dense<0.000000e+00> : vector<16x128xf32>
    %2 = tpu.matmul %0, %1, %cst {dimension_numbers = #tpu.dot_dimension_numbers<[1], [0], [0], [1], [0, 0, 1, 1], [], []>} : vector<16x4xbf16>, vector<4x128xbf16>, vector<16x128xf32> -> vector<16x128xf32>
    %c0_3 = arith.constant 0 : index
    %c0_4 = arith.constant 0 : index
    %3 = vector.load %arg5[%c0_3, %c0_4] : memref<1x128xf32, #tpu.memory_space<vmem>>, vector<1x128xf32>
    %4 = vector.broadcast %3 : vector<1x128xf32> to vector<16x128xf32>
    %5 = arith.addf %2, %4 : vector<16x128xf32>
    %6 = vector.shape_cast %5 : vector<16x128xf32> to vector<8x2x128xf32>
    %c0_5 = arith.constant 0 : index
    %c0_6 = arith.constant 0 : index
    %7 = vector.load %arg2[%c0_5, %c0_6] : memref<32x128xbf16, #tpu.memory_space<vmem>>, vector<32x128xbf16>
    %c0_7 = arith.constant 0 : index
    %c0_8 = arith.constant 0 : index
    %8 = vector.load %arg4[%c0_7, %c0_8] : memref<32x128xbf16, #tpu.memory_space<vmem>>, vector<32x128xbf16>
    %c0_9 = arith.constant 0 : index
    %c0_10 = arith.constant 0 : index
    %9 = vector.load %arg3[%c0_9, %c0_10] : memref<32x128xbf16, #tpu.memory_space<vmem>>, vector<32x128xbf16>
    %c0_11 = arith.constant 0 : index
    %c0_12 = arith.constant 0 : index
    %10 = vector.load %arg6[%c0_11, %c0_12] : memref<1x128xf32, #tpu.memory_space<vmem>>, vector<1x128xf32>
    %11 = vector.shape_cast %10 : vector<1x128xf32> to vector<1x128xf32>
    %12 = vector.broadcast %11 : vector<1x128xf32> to vector<2x128xf32>
    %13 = tpu.iota {dimensions = array<i32: 1>} : vector<1x128xi32>
    %c64_i32 = arith.constant 64 : i32
    %14 = vector.broadcast %c64_i32 : i32 to vector<1x128xi32>
    %15 = arith.cmpi sge, %13, %14 : vector<1x128xi32>
    %c96_i32 = arith.constant 96 : i32
    %16 = vector.broadcast %c96_i32 : i32 to vector<1x128xi32>
    %17 = arith.cmpi slt, %13, %16 : vector<1x128xi32>
    %18 = arith.andi %15, %17 : vector<1x128xi1>
    %cst_13 = arith.constant 1.000000e+00 : f32
    %cst_14 = arith.constant 5.000000e-01 : f32
    %19 = vector.broadcast %cst_13 : f32 to vector<1x128xf32>
    %20 = vector.broadcast %cst_14 : f32 to vector<1x128xf32>
    %21 = arith.select %18, %19, %20 : vector<1x128xi1>, vector<1x128xf32>
    %cst_15 = arith.constant 0.000000e+00 : f32
    %22 = vector.broadcast %cst_15 : f32 to vector<2x32xf32>
    %23 = vector.extract_strided_slice %6 {offsets = [0, 0, 0], sizes = [1, 2, 128], strides = [1, 1, 1]} : vector<8x2x128xf32> to vector<1x2x128xf32>
    %24 = vector.shape_cast %23 : vector<1x2x128xf32> to vector<2x128xf32>
    %25 = vector.broadcast %21 : vector<1x128xf32> to vector<2x128xf32>
    %26 = arith.mulf %24, %25 : vector<2x128xf32>
    %27 = math.tanh %26 : vector<2x128xf32>
    %28 = vector.extract_strided_slice %27 {offsets = [0, 0], sizes = [2, 32], strides = [1, 1]} : vector<2x128xf32> to vector<2x32xf32>
    %cst_16 = arith.constant 5.000000e-01 : f32
    %29 = vector.broadcast %cst_16 : f32 to vector<2x32xf32>
    %30 = arith.mulf %29, %28 : vector<2x32xf32>
    %cst_17 = arith.constant 5.000000e-01 : f32
    %31 = vector.broadcast %cst_17 : f32 to vector<2x32xf32>
    %32 = arith.addf %31, %30 : vector<2x32xf32>
    %33 = vector.extract_strided_slice %27 {offsets = [0, 32], sizes = [2, 32], strides = [1, 1]} : vector<2x128xf32> to vector<2x32xf32>
    %cst_18 = arith.constant 5.000000e-01 : f32
    %34 = vector.broadcast %cst_18 : f32 to vector<2x32xf32>
    %35 = arith.mulf %34, %33 : vector<2x32xf32>
    %cst_19 = arith.constant 5.000000e-01 : f32
    %36 = vector.broadcast %cst_19 : f32 to vector<2x32xf32>
    %37 = arith.addf %36, %35 : vector<2x32xf32>
    %38 = vector.extract_strided_slice %27 {offsets = [0, 64], sizes = [2, 32], strides = [1, 1]} : vector<2x128xf32> to vector<2x32xf32>
    %39 = vector.extract_strided_slice %27 {offsets = [0, 96], sizes = [2, 32], strides = [1, 1]} : vector<2x128xf32> to vector<2x32xf32>
    %cst_20 = arith.constant 5.000000e-01 : f32
    %40 = vector.broadcast %cst_20 : f32 to vector<2x32xf32>
    %41 = arith.mulf %40, %39 : vector<2x32xf32>
    %cst_21 = arith.constant 5.000000e-01 : f32
    %42 = vector.broadcast %cst_21 : f32 to vector<2x32xf32>
    %43 = arith.addf %42, %41 : vector<2x32xf32>
    %44 = arith.mulf %37, %22 : vector<2x32xf32>
    %45 = arith.mulf %32, %38 : vector<2x32xf32>
    %46 = arith.addf %44, %45 : vector<2x32xf32>
    %47 = math.tanh %46 : vector<2x32xf32>
    %48 = arith.mulf %43, %47 : vector<2x32xf32>
    %49 = arith.truncf %48 : vector<2x32xf32> to vector<2x32xbf16>
    %cst_22 = arith.constant dense<0.000000e+00> : vector<2x128xf32>
    %50 = tpu.matmul %49, %9, %cst_22 {dimension_numbers = #tpu.dot_dimension_numbers<[1], [0], [0], [1], [0, 0, 1, 1], [], []>} : vector<2x32xbf16>, vector<32x128xbf16>, vector<2x128xf32> -> vector<2x128xf32>
    %51 = arith.addf %50, %12 : vector<2x128xf32>
    %52 = vector.broadcast %21 : vector<1x128xf32> to vector<2x128xf32>
    %53 = arith.mulf %51, %52 : vector<2x128xf32>
    %54 = math.tanh %53 : vector<2x128xf32>
    %55 = vector.extract_strided_slice %54 {offsets = [0, 0], sizes = [2, 32], strides = [1, 1]} : vector<2x128xf32> to vector<2x32xf32>
    %cst_23 = arith.constant 5.000000e-01 : f32
    %56 = vector.broadcast %cst_23 : f32 to vector<2x32xf32>
    %57 = arith.mulf %56, %55 : vector<2x32xf32>
    %cst_24 = arith.constant 5.000000e-01 : f32
    %58 = vector.broadcast %cst_24 : f32 to vector<2x32xf32>
    %59 = arith.addf %58, %57 : vector<2x32xf32>
    %60 = vector.extract_strided_slice %54 {offsets = [0, 32], sizes = [2, 32], strides = [1, 1]} : vector<2x128xf32> to vector<2x32xf32>
    %cst_25 = arith.constant 5.000000e-01 : f32
    %61 = vector.broadcast %cst_25 : f32 to vector<2x32xf32>
    %62 = arith.mulf %61, %60 : vector<2x32xf32>
    %cst_26 = arith.constant 5.000000e-01 : f32
    %63 = vector.broadcast %cst_26 : f32 to vector<2x32xf32>
    %64 = arith.addf %63, %62 : vector<2x32xf32>
    %65 = vector.extract_strided_slice %54 {offsets = [0, 64], sizes = [2, 32], strides = [1, 1]} : vector<2x128xf32> to vector<2x32xf32>
    %66 = vector.extract_strided_slice %54 {offsets = [0, 96], sizes = [2, 32], strides = [1, 1]} : vector<2x128xf32> to vector<2x32xf32>
    %cst_27 = arith.constant 5.000000e-01 : f32
    %67 = vector.broadcast %cst_27 : f32 to vector<2x32xf32>
    %68 = arith.mulf %67, %66 : vector<2x32xf32>
    %cst_28 = arith.constant 5.000000e-01 : f32
    %69 = vector.broadcast %cst_28 : f32 to vector<2x32xf32>
    %70 = arith.addf %69, %68 : vector<2x32xf32>
    %71 = arith.mulf %64, %22 : vector<2x32xf32>
    %72 = arith.mulf %59, %65 : vector<2x32xf32>
    %73 = arith.addf %71, %72 : vector<2x32xf32>
    %74 = math.tanh %73 : vector<2x32xf32>
    %75 = arith.mulf %70, %74 : vector<2x32xf32>
    %76 = arith.truncf %75 : vector<2x32xf32> to vector<2x32xbf16>
    %cst_29 = arith.constant dense<0.000000e+00> : vector<2x128xf32>
    %77 = tpu.matmul %76, %8, %cst_29 {dimension_numbers = #tpu.dot_dimension_numbers<[1], [0], [0], [1], [0, 0, 1, 1], [], []>} : vector<2x32xbf16>, vector<32x128xbf16>, vector<2x128xf32> -> vector<2x128xf32>
    %78 = arith.addf %77, %12 : vector<2x128xf32>
    %79 = vector.extract_strided_slice %6 {offsets = [1, 0, 0], sizes = [1, 2, 128], strides = [1, 1, 1]} : vector<8x2x128xf32> to vector<1x2x128xf32>
    %80 = vector.shape_cast %79 : vector<1x2x128xf32> to vector<2x128xf32>
    %81 = arith.truncf %48 : vector<2x32xf32> to vector<2x32xbf16>
    %cst_30 = arith.constant dense<0.000000e+00> : vector<2x128xf32>
    %82 = tpu.matmul %81, %7, %cst_30 {dimension_numbers = #tpu.dot_dimension_numbers<[1], [0], [0], [1], [0, 0, 1, 1], [], []>} : vector<2x32xbf16>, vector<32x128xbf16>, vector<2x128xf32> -> vector<2x128xf32>
    %83 = arith.addf %80, %82 : vector<2x128xf32>
    %84 = vector.broadcast %21 : vector<1x128xf32> to vector<2x128xf32>
    %85 = arith.mulf %83, %84 : vector<2x128xf32>
    %86 = math.tanh %85 : vector<2x128xf32>
    %87 = vector.extract_strided_slice %86 {offsets = [0, 0], sizes = [2, 32], strides = [1, 1]} : vector<2x128xf32> to vector<2x32xf32>
    %cst_31 = arith.constant 5.000000e-01 : f32
    %88 = vector.broadcast %cst_31 : f32 to vector<2x32xf32>
    %89 = arith.mulf %88, %87 : vector<2x32xf32>
    %cst_32 = arith.constant 5.000000e-01 : f32
    %90 = vector.broadcast %cst_32 : f32 to vector<2x32xf32>
    %91 = arith.addf %90, %89 : vector<2x32xf32>
    %92 = vector.extract_strided_slice %86 {offsets = [0, 32], sizes = [2, 32], strides = [1, 1]} : vector<2x128xf32> to vector<2x32xf32>
    %cst_33 = arith.constant 5.000000e-01 : f32
    %93 = vector.broadcast %cst_33 : f32 to vector<2x32xf32>
    %94 = arith.mulf %93, %92 : vector<2x32xf32>
    %cst_34 = arith.constant 5.000000e-01 : f32
    %95 = vector.broadcast %cst_34 : f32 to vector<2x32xf32>
    %96 = arith.addf %95, %94 : vector<2x32xf32>
    %97 = vector.extract_strided_slice %86 {offsets = [0, 64], sizes = [2, 32], strides = [1, 1]} : vector<2x128xf32> to vector<2x32xf32>
    %98 = vector.extract_strided_slice %86 {offsets = [0, 96], sizes = [2, 32], strides = [1, 1]} : vector<2x128xf32> to vector<2x32xf32>
    %cst_35 = arith.constant 5.000000e-01 : f32
    %99 = vector.broadcast %cst_35 : f32 to vector<2x32xf32>
    %100 = arith.mulf %99, %98 : vector<2x32xf32>
    %cst_36 = arith.constant 5.000000e-01 : f32
    %101 = vector.broadcast %cst_36 : f32 to vector<2x32xf32>
    %102 = arith.addf %101, %100 : vector<2x32xf32>
    %103 = arith.mulf %96, %46 : vector<2x32xf32>
    %104 = arith.mulf %91, %97 : vector<2x32xf32>
    %105 = arith.addf %103, %104 : vector<2x32xf32>
    %106 = math.tanh %105 : vector<2x32xf32>
    %107 = arith.mulf %102, %106 : vector<2x32xf32>
    %108 = arith.truncf %107 : vector<2x32xf32> to vector<2x32xbf16>
    %cst_37 = arith.constant dense<0.000000e+00> : vector<2x128xf32>
    %109 = tpu.matmul %108, %9, %cst_37 {dimension_numbers = #tpu.dot_dimension_numbers<[1], [0], [0], [1], [0, 0, 1, 1], [], []>} : vector<2x32xbf16>, vector<32x128xbf16>, vector<2x128xf32> -> vector<2x128xf32>
    %110 = arith.addf %109, %78 : vector<2x128xf32>
    %111 = vector.broadcast %21 : vector<1x128xf32> to vector<2x128xf32>
    %112 = arith.mulf %110, %111 : vector<2x128xf32>
    %113 = math.tanh %112 : vector<2x128xf32>
    %114 = vector.extract_strided_slice %113 {offsets = [0, 0], sizes = [2, 32], strides = [1, 1]} : vector<2x128xf32> to vector<2x32xf32>
    %cst_38 = arith.constant 5.000000e-01 : f32
    %115 = vector.broadcast %cst_38 : f32 to vector<2x32xf32>
    %116 = arith.mulf %115, %114 : vector<2x32xf32>
    %cst_39 = arith.constant 5.000000e-01 : f32
    %117 = vector.broadcast %cst_39 : f32 to vector<2x32xf32>
    %118 = arith.addf %117, %116 : vector<2x32xf32>
    %119 = vector.extract_strided_slice %113 {offsets = [0, 32], sizes = [2, 32], strides = [1, 1]} : vector<2x128xf32> to vector<2x32xf32>
    %cst_40 = arith.constant 5.000000e-01 : f32
    %120 = vector.broadcast %cst_40 : f32 to vector<2x32xf32>
    %121 = arith.mulf %120, %119 : vector<2x32xf32>
    %cst_41 = arith.constant 5.000000e-01 : f32
    %122 = vector.broadcast %cst_41 : f32 to vector<2x32xf32>
    %123 = arith.addf %122, %121 : vector<2x32xf32>
    %124 = vector.extract_strided_slice %113 {offsets = [0, 64], sizes = [2, 32], strides = [1, 1]} : vector<2x128xf32> to vector<2x32xf32>
    %125 = vector.extract_strided_slice %113 {offsets = [0, 96], sizes = [2, 32], strides = [1, 1]} : vector<2x128xf32> to vector<2x32xf32>
    %cst_42 = arith.constant 5.000000e-01 : f32
    %126 = vector.broadcast %cst_42 : f32 to vector<2x32xf32>
    %127 = arith.mulf %126, %125 : vector<2x32xf32>
    %cst_43 = arith.constant 5.000000e-01 : f32
    %128 = vector.broadcast %cst_43 : f32 to vector<2x32xf32>
    %129 = arith.addf %128, %127 : vector<2x32xf32>
    %130 = arith.mulf %123, %73 : vector<2x32xf32>
    %131 = arith.mulf %118, %124 : vector<2x32xf32>
    %132 = arith.addf %130, %131 : vector<2x32xf32>
    %133 = math.tanh %132 : vector<2x32xf32>
    %134 = arith.mulf %129, %133 : vector<2x32xf32>
    %135 = arith.truncf %134 : vector<2x32xf32> to vector<2x32xbf16>
    %cst_44 = arith.constant dense<0.000000e+00> : vector<2x128xf32>
    %136 = tpu.matmul %135, %8, %cst_44 {dimension_numbers = #tpu.dot_dimension_numbers<[1], [0], [0], [1], [0, 0, 1, 1], [], []>} : vector<2x32xbf16>, vector<32x128xbf16>, vector<2x128xf32> -> vector<2x128xf32>
    %137 = arith.addf %136, %12 : vector<2x128xf32>
    %138 = vector.extract_strided_slice %6 {offsets = [2, 0, 0], sizes = [1, 2, 128], strides = [1, 1, 1]} : vector<8x2x128xf32> to vector<1x2x128xf32>
    %139 = vector.shape_cast %138 : vector<1x2x128xf32> to vector<2x128xf32>
    %140 = arith.truncf %107 : vector<2x32xf32> to vector<2x32xbf16>
    %cst_45 = arith.constant dense<0.000000e+00> : vector<2x128xf32>
    %141 = tpu.matmul %140, %7, %cst_45 {dimension_numbers = #tpu.dot_dimension_numbers<[1], [0], [0], [1], [0, 0, 1, 1], [], []>} : vector<2x32xbf16>, vector<32x128xbf16>, vector<2x128xf32> -> vector<2x128xf32>
    %142 = arith.addf %139, %141 : vector<2x128xf32>
    %143 = vector.broadcast %21 : vector<1x128xf32> to vector<2x128xf32>
    %144 = arith.mulf %142, %143 : vector<2x128xf32>
    %145 = math.tanh %144 : vector<2x128xf32>
    %146 = vector.extract_strided_slice %145 {offsets = [0, 0], sizes = [2, 32], strides = [1, 1]} : vector<2x128xf32> to vector<2x32xf32>
    %cst_46 = arith.constant 5.000000e-01 : f32
    %147 = vector.broadcast %cst_46 : f32 to vector<2x32xf32>
    %148 = arith.mulf %147, %146 : vector<2x32xf32>
    %cst_47 = arith.constant 5.000000e-01 : f32
    %149 = vector.broadcast %cst_47 : f32 to vector<2x32xf32>
    %150 = arith.addf %149, %148 : vector<2x32xf32>
    %151 = vector.extract_strided_slice %145 {offsets = [0, 32], sizes = [2, 32], strides = [1, 1]} : vector<2x128xf32> to vector<2x32xf32>
    %cst_48 = arith.constant 5.000000e-01 : f32
    %152 = vector.broadcast %cst_48 : f32 to vector<2x32xf32>
    %153 = arith.mulf %152, %151 : vector<2x32xf32>
    %cst_49 = arith.constant 5.000000e-01 : f32
    %154 = vector.broadcast %cst_49 : f32 to vector<2x32xf32>
    %155 = arith.addf %154, %153 : vector<2x32xf32>
    %156 = vector.extract_strided_slice %145 {offsets = [0, 64], sizes = [2, 32], strides = [1, 1]} : vector<2x128xf32> to vector<2x32xf32>
    %157 = vector.extract_strided_slice %145 {offsets = [0, 96], sizes = [2, 32], strides = [1, 1]} : vector<2x128xf32> to vector<2x32xf32>
    %cst_50 = arith.constant 5.000000e-01 : f32
    %158 = vector.broadcast %cst_50 : f32 to vector<2x32xf32>
    %159 = arith.mulf %158, %157 : vector<2x32xf32>
    %cst_51 = arith.constant 5.000000e-01 : f32
    %160 = vector.broadcast %cst_51 : f32 to vector<2x32xf32>
    %161 = arith.addf %160, %159 : vector<2x32xf32>
    %162 = arith.mulf %155, %105 : vector<2x32xf32>
    %163 = arith.mulf %150, %156 : vector<2x32xf32>
    %164 = arith.addf %162, %163 : vector<2x32xf32>
    %165 = math.tanh %164 : vector<2x32xf32>
    %166 = arith.mulf %161, %165 : vector<2x32xf32>
    %167 = arith.truncf %166 : vector<2x32xf32> to vector<2x32xbf16>
    %cst_52 = arith.constant dense<0.000000e+00> : vector<2x128xf32>
    %168 = tpu.matmul %167, %9, %cst_52 {dimension_numbers = #tpu.dot_dimension_numbers<[1], [0], [0], [1], [0, 0, 1, 1], [], []>} : vector<2x32xbf16>, vector<32x128xbf16>, vector<2x128xf32> -> vector<2x128xf32>
    %169 = arith.addf %168, %137 : vector<2x128xf32>
    %170 = vector.broadcast %21 : vector<1x128xf32> to vector<2x128xf32>
    %171 = arith.mulf %169, %170 : vector<2x128xf32>
    %172 = math.tanh %171 : vector<2x128xf32>
    %173 = vector.extract_strided_slice %172 {offsets = [0, 0], sizes = [2, 32], strides = [1, 1]} : vector<2x128xf32> to vector<2x32xf32>
    %cst_53 = arith.constant 5.000000e-01 : f32
    %174 = vector.broadcast %cst_53 : f32 to vector<2x32xf32>
    %175 = arith.mulf %174, %173 : vector<2x32xf32>
    %cst_54 = arith.constant 5.000000e-01 : f32
    %176 = vector.broadcast %cst_54 : f32 to vector<2x32xf32>
    %177 = arith.addf %176, %175 : vector<2x32xf32>
    %178 = vector.extract_strided_slice %172 {offsets = [0, 32], sizes = [2, 32], strides = [1, 1]} : vector<2x128xf32> to vector<2x32xf32>
    %cst_55 = arith.constant 5.000000e-01 : f32
    %179 = vector.broadcast %cst_55 : f32 to vector<2x32xf32>
    %180 = arith.mulf %179, %178 : vector<2x32xf32>
    %cst_56 = arith.constant 5.000000e-01 : f32
    %181 = vector.broadcast %cst_56 : f32 to vector<2x32xf32>
    %182 = arith.addf %181, %180 : vector<2x32xf32>
    %183 = vector.extract_strided_slice %172 {offsets = [0, 64], sizes = [2, 32], strides = [1, 1]} : vector<2x128xf32> to vector<2x32xf32>
    %184 = vector.extract_strided_slice %172 {offsets = [0, 96], sizes = [2, 32], strides = [1, 1]} : vector<2x128xf32> to vector<2x32xf32>
    %cst_57 = arith.constant 5.000000e-01 : f32
    %185 = vector.broadcast %cst_57 : f32 to vector<2x32xf32>
    %186 = arith.mulf %185, %184 : vector<2x32xf32>
    %cst_58 = arith.constant 5.000000e-01 : f32
    %187 = vector.broadcast %cst_58 : f32 to vector<2x32xf32>
    %188 = arith.addf %187, %186 : vector<2x32xf32>
    %189 = arith.mulf %182, %132 : vector<2x32xf32>
    %190 = arith.mulf %177, %183 : vector<2x32xf32>
    %191 = arith.addf %189, %190 : vector<2x32xf32>
    %192 = math.tanh %191 : vector<2x32xf32>
    %193 = arith.mulf %188, %192 : vector<2x32xf32>
    %194 = arith.truncf %193 : vector<2x32xf32> to vector<2x32xbf16>
    %cst_59 = arith.constant dense<0.000000e+00> : vector<2x128xf32>
    %195 = tpu.matmul %194, %8, %cst_59 {dimension_numbers = #tpu.dot_dimension_numbers<[1], [0], [0], [1], [0, 0, 1, 1], [], []>} : vector<2x32xbf16>, vector<32x128xbf16>, vector<2x128xf32> -> vector<2x128xf32>
    %196 = arith.addf %195, %12 : vector<2x128xf32>
    %197 = vector.extract_strided_slice %6 {offsets = [3, 0, 0], sizes = [1, 2, 128], strides = [1, 1, 1]} : vector<8x2x128xf32> to vector<1x2x128xf32>
    %198 = vector.shape_cast %197 : vector<1x2x128xf32> to vector<2x128xf32>
    %199 = arith.truncf %166 : vector<2x32xf32> to vector<2x32xbf16>
    %cst_60 = arith.constant dense<0.000000e+00> : vector<2x128xf32>
    %200 = tpu.matmul %199, %7, %cst_60 {dimension_numbers = #tpu.dot_dimension_numbers<[1], [0], [0], [1], [0, 0, 1, 1], [], []>} : vector<2x32xbf16>, vector<32x128xbf16>, vector<2x128xf32> -> vector<2x128xf32>
    %201 = arith.addf %198, %200 : vector<2x128xf32>
    %202 = vector.broadcast %21 : vector<1x128xf32> to vector<2x128xf32>
    %203 = arith.mulf %201, %202 : vector<2x128xf32>
    %204 = math.tanh %203 : vector<2x128xf32>
    %205 = vector.extract_strided_slice %204 {offsets = [0, 0], sizes = [2, 32], strides = [1, 1]} : vector<2x128xf32> to vector<2x32xf32>
    %cst_61 = arith.constant 5.000000e-01 : f32
    %206 = vector.broadcast %cst_61 : f32 to vector<2x32xf32>
    %207 = arith.mulf %206, %205 : vector<2x32xf32>
    %cst_62 = arith.constant 5.000000e-01 : f32
    %208 = vector.broadcast %cst_62 : f32 to vector<2x32xf32>
    %209 = arith.addf %208, %207 : vector<2x32xf32>
    %210 = vector.extract_strided_slice %204 {offsets = [0, 32], sizes = [2, 32], strides = [1, 1]} : vector<2x128xf32> to vector<2x32xf32>
    %cst_63 = arith.constant 5.000000e-01 : f32
    %211 = vector.broadcast %cst_63 : f32 to vector<2x32xf32>
    %212 = arith.mulf %211, %210 : vector<2x32xf32>
    %cst_64 = arith.constant 5.000000e-01 : f32
    %213 = vector.broadcast %cst_64 : f32 to vector<2x32xf32>
    %214 = arith.addf %213, %212 : vector<2x32xf32>
    %215 = vector.extract_strided_slice %204 {offsets = [0, 64], sizes = [2, 32], strides = [1, 1]} : vector<2x128xf32> to vector<2x32xf32>
    %216 = vector.extract_strided_slice %204 {offsets = [0, 96], sizes = [2, 32], strides = [1, 1]} : vector<2x128xf32> to vector<2x32xf32>
    %cst_65 = arith.constant 5.000000e-01 : f32
    %217 = vector.broadcast %cst_65 : f32 to vector<2x32xf32>
    %218 = arith.mulf %217, %216 : vector<2x32xf32>
    %cst_66 = arith.constant 5.000000e-01 : f32
    %219 = vector.broadcast %cst_66 : f32 to vector<2x32xf32>
    %220 = arith.addf %219, %218 : vector<2x32xf32>
    %221 = arith.mulf %214, %164 : vector<2x32xf32>
    %222 = arith.mulf %209, %215 : vector<2x32xf32>
    %223 = arith.addf %221, %222 : vector<2x32xf32>
    %224 = math.tanh %223 : vector<2x32xf32>
    %225 = arith.mulf %220, %224 : vector<2x32xf32>
    %226 = arith.truncf %225 : vector<2x32xf32> to vector<2x32xbf16>
    %cst_67 = arith.constant dense<0.000000e+00> : vector<2x128xf32>
    %227 = tpu.matmul %226, %9, %cst_67 {dimension_numbers = #tpu.dot_dimension_numbers<[1], [0], [0], [1], [0, 0, 1, 1], [], []>} : vector<2x32xbf16>, vector<32x128xbf16>, vector<2x128xf32> -> vector<2x128xf32>
    %228 = arith.addf %227, %196 : vector<2x128xf32>
    %229 = vector.broadcast %21 : vector<1x128xf32> to vector<2x128xf32>
    %230 = arith.mulf %228, %229 : vector<2x128xf32>
    %231 = math.tanh %230 : vector<2x128xf32>
    %232 = vector.extract_strided_slice %231 {offsets = [0, 0], sizes = [2, 32], strides = [1, 1]} : vector<2x128xf32> to vector<2x32xf32>
    %cst_68 = arith.constant 5.000000e-01 : f32
    %233 = vector.broadcast %cst_68 : f32 to vector<2x32xf32>
    %234 = arith.mulf %233, %232 : vector<2x32xf32>
    %cst_69 = arith.constant 5.000000e-01 : f32
    %235 = vector.broadcast %cst_69 : f32 to vector<2x32xf32>
    %236 = arith.addf %235, %234 : vector<2x32xf32>
    %237 = vector.extract_strided_slice %231 {offsets = [0, 32], sizes = [2, 32], strides = [1, 1]} : vector<2x128xf32> to vector<2x32xf32>
    %cst_70 = arith.constant 5.000000e-01 : f32
    %238 = vector.broadcast %cst_70 : f32 to vector<2x32xf32>
    %239 = arith.mulf %238, %237 : vector<2x32xf32>
    %cst_71 = arith.constant 5.000000e-01 : f32
    %240 = vector.broadcast %cst_71 : f32 to vector<2x32xf32>
    %241 = arith.addf %240, %239 : vector<2x32xf32>
    %242 = vector.extract_strided_slice %231 {offsets = [0, 64], sizes = [2, 32], strides = [1, 1]} : vector<2x128xf32> to vector<2x32xf32>
    %243 = vector.extract_strided_slice %231 {offsets = [0, 96], sizes = [2, 32], strides = [1, 1]} : vector<2x128xf32> to vector<2x32xf32>
    %cst_72 = arith.constant 5.000000e-01 : f32
    %244 = vector.broadcast %cst_72 : f32 to vector<2x32xf32>
    %245 = arith.mulf %244, %243 : vector<2x32xf32>
    %cst_73 = arith.constant 5.000000e-01 : f32
    %246 = vector.broadcast %cst_73 : f32 to vector<2x32xf32>
    %247 = arith.addf %246, %245 : vector<2x32xf32>
    %248 = arith.mulf %241, %191 : vector<2x32xf32>
    %249 = arith.mulf %236, %242 : vector<2x32xf32>
    %250 = arith.addf %248, %249 : vector<2x32xf32>
    %251 = math.tanh %250 : vector<2x32xf32>
    %252 = arith.mulf %247, %251 : vector<2x32xf32>
    %253 = arith.truncf %252 : vector<2x32xf32> to vector<2x32xbf16>
    %cst_74 = arith.constant dense<0.000000e+00> : vector<2x128xf32>
    %254 = tpu.matmul %253, %8, %cst_74 {dimension_numbers = #tpu.dot_dimension_numbers<[1], [0], [0], [1], [0, 0, 1, 1], [], []>} : vector<2x32xbf16>, vector<32x128xbf16>, vector<2x128xf32> -> vector<2x128xf32>
    %255 = arith.addf %254, %12 : vector<2x128xf32>
    %256 = vector.extract_strided_slice %6 {offsets = [4, 0, 0], sizes = [1, 2, 128], strides = [1, 1, 1]} : vector<8x2x128xf32> to vector<1x2x128xf32>
    %257 = vector.shape_cast %256 : vector<1x2x128xf32> to vector<2x128xf32>
    %258 = arith.truncf %225 : vector<2x32xf32> to vector<2x32xbf16>
    %cst_75 = arith.constant dense<0.000000e+00> : vector<2x128xf32>
    %259 = tpu.matmul %258, %7, %cst_75 {dimension_numbers = #tpu.dot_dimension_numbers<[1], [0], [0], [1], [0, 0, 1, 1], [], []>} : vector<2x32xbf16>, vector<32x128xbf16>, vector<2x128xf32> -> vector<2x128xf32>
    %260 = arith.addf %257, %259 : vector<2x128xf32>
    %261 = vector.broadcast %21 : vector<1x128xf32> to vector<2x128xf32>
    %262 = arith.mulf %260, %261 : vector<2x128xf32>
    %263 = math.tanh %262 : vector<2x128xf32>
    %264 = vector.extract_strided_slice %263 {offsets = [0, 0], sizes = [2, 32], strides = [1, 1]} : vector<2x128xf32> to vector<2x32xf32>
    %cst_76 = arith.constant 5.000000e-01 : f32
    %265 = vector.broadcast %cst_76 : f32 to vector<2x32xf32>
    %266 = arith.mulf %265, %264 : vector<2x32xf32>
    %cst_77 = arith.constant 5.000000e-01 : f32
    %267 = vector.broadcast %cst_77 : f32 to vector<2x32xf32>
    %268 = arith.addf %267, %266 : vector<2x32xf32>
    %269 = vector.extract_strided_slice %263 {offsets = [0, 32], sizes = [2, 32], strides = [1, 1]} : vector<2x128xf32> to vector<2x32xf32>
    %cst_78 = arith.constant 5.000000e-01 : f32
    %270 = vector.broadcast %cst_78 : f32 to vector<2x32xf32>
    %271 = arith.mulf %270, %269 : vector<2x32xf32>
    %cst_79 = arith.constant 5.000000e-01 : f32
    %272 = vector.broadcast %cst_79 : f32 to vector<2x32xf32>
    %273 = arith.addf %272, %271 : vector<2x32xf32>
    %274 = vector.extract_strided_slice %263 {offsets = [0, 64], sizes = [2, 32], strides = [1, 1]} : vector<2x128xf32> to vector<2x32xf32>
    %275 = vector.extract_strided_slice %263 {offsets = [0, 96], sizes = [2, 32], strides = [1, 1]} : vector<2x128xf32> to vector<2x32xf32>
    %cst_80 = arith.constant 5.000000e-01 : f32
    %276 = vector.broadcast %cst_80 : f32 to vector<2x32xf32>
    %277 = arith.mulf %276, %275 : vector<2x32xf32>
    %cst_81 = arith.constant 5.000000e-01 : f32
    %278 = vector.broadcast %cst_81 : f32 to vector<2x32xf32>
    %279 = arith.addf %278, %277 : vector<2x32xf32>
    %280 = arith.mulf %273, %223 : vector<2x32xf32>
    %281 = arith.mulf %268, %274 : vector<2x32xf32>
    %282 = arith.addf %280, %281 : vector<2x32xf32>
    %283 = math.tanh %282 : vector<2x32xf32>
    %284 = arith.mulf %279, %283 : vector<2x32xf32>
    %285 = arith.truncf %284 : vector<2x32xf32> to vector<2x32xbf16>
    %cst_82 = arith.constant dense<0.000000e+00> : vector<2x128xf32>
    %286 = tpu.matmul %285, %9, %cst_82 {dimension_numbers = #tpu.dot_dimension_numbers<[1], [0], [0], [1], [0, 0, 1, 1], [], []>} : vector<2x32xbf16>, vector<32x128xbf16>, vector<2x128xf32> -> vector<2x128xf32>
    %287 = arith.addf %286, %255 : vector<2x128xf32>
    %288 = vector.broadcast %21 : vector<1x128xf32> to vector<2x128xf32>
    %289 = arith.mulf %287, %288 : vector<2x128xf32>
    %290 = math.tanh %289 : vector<2x128xf32>
    %291 = vector.extract_strided_slice %290 {offsets = [0, 0], sizes = [2, 32], strides = [1, 1]} : vector<2x128xf32> to vector<2x32xf32>
    %cst_83 = arith.constant 5.000000e-01 : f32
    %292 = vector.broadcast %cst_83 : f32 to vector<2x32xf32>
    %293 = arith.mulf %292, %291 : vector<2x32xf32>
    %cst_84 = arith.constant 5.000000e-01 : f32
    %294 = vector.broadcast %cst_84 : f32 to vector<2x32xf32>
    %295 = arith.addf %294, %293 : vector<2x32xf32>
    %296 = vector.extract_strided_slice %290 {offsets = [0, 32], sizes = [2, 32], strides = [1, 1]} : vector<2x128xf32> to vector<2x32xf32>
    %cst_85 = arith.constant 5.000000e-01 : f32
    %297 = vector.broadcast %cst_85 : f32 to vector<2x32xf32>
    %298 = arith.mulf %297, %296 : vector<2x32xf32>
    %cst_86 = arith.constant 5.000000e-01 : f32
    %299 = vector.broadcast %cst_86 : f32 to vector<2x32xf32>
    %300 = arith.addf %299, %298 : vector<2x32xf32>
    %301 = vector.extract_strided_slice %290 {offsets = [0, 64], sizes = [2, 32], strides = [1, 1]} : vector<2x128xf32> to vector<2x32xf32>
    %302 = vector.extract_strided_slice %290 {offsets = [0, 96], sizes = [2, 32], strides = [1, 1]} : vector<2x128xf32> to vector<2x32xf32>
    %cst_87 = arith.constant 5.000000e-01 : f32
    %303 = vector.broadcast %cst_87 : f32 to vector<2x32xf32>
    %304 = arith.mulf %303, %302 : vector<2x32xf32>
    %cst_88 = arith.constant 5.000000e-01 : f32
    %305 = vector.broadcast %cst_88 : f32 to vector<2x32xf32>
    %306 = arith.addf %305, %304 : vector<2x32xf32>
    %307 = arith.mulf %300, %250 : vector<2x32xf32>
    %308 = arith.mulf %295, %301 : vector<2x32xf32>
    %309 = arith.addf %307, %308 : vector<2x32xf32>
    %310 = math.tanh %309 : vector<2x32xf32>
    %311 = arith.mulf %306, %310 : vector<2x32xf32>
    %312 = arith.truncf %311 : vector<2x32xf32> to vector<2x32xbf16>
    %cst_89 = arith.constant dense<0.000000e+00> : vector<2x128xf32>
    %313 = tpu.matmul %312, %8, %cst_89 {dimension_numbers = #tpu.dot_dimension_numbers<[1], [0], [0], [1], [0, 0, 1, 1], [], []>} : vector<2x32xbf16>, vector<32x128xbf16>, vector<2x128xf32> -> vector<2x128xf32>
    %314 = arith.addf %313, %12 : vector<2x128xf32>
    %315 = vector.extract_strided_slice %6 {offsets = [5, 0, 0], sizes = [1, 2, 128], strides = [1, 1, 1]} : vector<8x2x128xf32> to vector<1x2x128xf32>
    %316 = vector.shape_cast %315 : vector<1x2x128xf32> to vector<2x128xf32>
    %317 = arith.truncf %284 : vector<2x32xf32> to vector<2x32xbf16>
    %cst_90 = arith.constant dense<0.000000e+00> : vector<2x128xf32>
    %318 = tpu.matmul %317, %7, %cst_90 {dimension_numbers = #tpu.dot_dimension_numbers<[1], [0], [0], [1], [0, 0, 1, 1], [], []>} : vector<2x32xbf16>, vector<32x128xbf16>, vector<2x128xf32> -> vector<2x128xf32>
    %319 = arith.addf %316, %318 : vector<2x128xf32>
    %320 = vector.broadcast %21 : vector<1x128xf32> to vector<2x128xf32>
    %321 = arith.mulf %319, %320 : vector<2x128xf32>
    %322 = math.tanh %321 : vector<2x128xf32>
    %323 = vector.extract_strided_slice %322 {offsets = [0, 0], sizes = [2, 32], strides = [1, 1]} : vector<2x128xf32> to vector<2x32xf32>
    %cst_91 = arith.constant 5.000000e-01 : f32
    %324 = vector.broadcast %cst_91 : f32 to vector<2x32xf32>
    %325 = arith.mulf %324, %323 : vector<2x32xf32>
    %cst_92 = arith.constant 5.000000e-01 : f32
    %326 = vector.broadcast %cst_92 : f32 to vector<2x32xf32>
    %327 = arith.addf %326, %325 : vector<2x32xf32>
    %328 = vector.extract_strided_slice %322 {offsets = [0, 32], sizes = [2, 32], strides = [1, 1]} : vector<2x128xf32> to vector<2x32xf32>
    %cst_93 = arith.constant 5.000000e-01 : f32
    %329 = vector.broadcast %cst_93 : f32 to vector<2x32xf32>
    %330 = arith.mulf %329, %328 : vector<2x32xf32>
    %cst_94 = arith.constant 5.000000e-01 : f32
    %331 = vector.broadcast %cst_94 : f32 to vector<2x32xf32>
    %332 = arith.addf %331, %330 : vector<2x32xf32>
    %333 = vector.extract_strided_slice %322 {offsets = [0, 64], sizes = [2, 32], strides = [1, 1]} : vector<2x128xf32> to vector<2x32xf32>
    %334 = vector.extract_strided_slice %322 {offsets = [0, 96], sizes = [2, 32], strides = [1, 1]} : vector<2x128xf32> to vector<2x32xf32>
    %cst_95 = arith.constant 5.000000e-01 : f32
    %335 = vector.broadcast %cst_95 : f32 to vector<2x32xf32>
    %336 = arith.mulf %335, %334 : vector<2x32xf32>
    %cst_96 = arith.constant 5.000000e-01 : f32
    %337 = vector.broadcast %cst_96 : f32 to vector<2x32xf32>
    %338 = arith.addf %337, %336 : vector<2x32xf32>
    %339 = arith.mulf %332, %282 : vector<2x32xf32>
    %340 = arith.mulf %327, %333 : vector<2x32xf32>
    %341 = arith.addf %339, %340 : vector<2x32xf32>
    %342 = math.tanh %341 : vector<2x32xf32>
    %343 = arith.mulf %338, %342 : vector<2x32xf32>
    %344 = arith.truncf %343 : vector<2x32xf32> to vector<2x32xbf16>
    %cst_97 = arith.constant dense<0.000000e+00> : vector<2x128xf32>
    %345 = tpu.matmul %344, %9, %cst_97 {dimension_numbers = #tpu.dot_dimension_numbers<[1], [0], [0], [1], [0, 0, 1, 1], [], []>} : vector<2x32xbf16>, vector<32x128xbf16>, vector<2x128xf32> -> vector<2x128xf32>
    %346 = arith.addf %345, %314 : vector<2x128xf32>
    %347 = vector.broadcast %21 : vector<1x128xf32> to vector<2x128xf32>
    %348 = arith.mulf %346, %347 : vector<2x128xf32>
    %349 = math.tanh %348 : vector<2x128xf32>
    %350 = vector.extract_strided_slice %349 {offsets = [0, 0], sizes = [2, 32], strides = [1, 1]} : vector<2x128xf32> to vector<2x32xf32>
    %cst_98 = arith.constant 5.000000e-01 : f32
    %351 = vector.broadcast %cst_98 : f32 to vector<2x32xf32>
    %352 = arith.mulf %351, %350 : vector<2x32xf32>
    %cst_99 = arith.constant 5.000000e-01 : f32
    %353 = vector.broadcast %cst_99 : f32 to vector<2x32xf32>
    %354 = arith.addf %353, %352 : vector<2x32xf32>
    %355 = vector.extract_strided_slice %349 {offsets = [0, 32], sizes = [2, 32], strides = [1, 1]} : vector<2x128xf32> to vector<2x32xf32>
    %cst_100 = arith.constant 5.000000e-01 : f32
    %356 = vector.broadcast %cst_100 : f32 to vector<2x32xf32>
    %357 = arith.mulf %356, %355 : vector<2x32xf32>
    %cst_101 = arith.constant 5.000000e-01 : f32
    %358 = vector.broadcast %cst_101 : f32 to vector<2x32xf32>
    %359 = arith.addf %358, %357 : vector<2x32xf32>
    %360 = vector.extract_strided_slice %349 {offsets = [0, 64], sizes = [2, 32], strides = [1, 1]} : vector<2x128xf32> to vector<2x32xf32>
    %361 = vector.extract_strided_slice %349 {offsets = [0, 96], sizes = [2, 32], strides = [1, 1]} : vector<2x128xf32> to vector<2x32xf32>
    %cst_102 = arith.constant 5.000000e-01 : f32
    %362 = vector.broadcast %cst_102 : f32 to vector<2x32xf32>
    %363 = arith.mulf %362, %361 : vector<2x32xf32>
    %cst_103 = arith.constant 5.000000e-01 : f32
    %364 = vector.broadcast %cst_103 : f32 to vector<2x32xf32>
    %365 = arith.addf %364, %363 : vector<2x32xf32>
    %366 = arith.mulf %359, %309 : vector<2x32xf32>
    %367 = arith.mulf %354, %360 : vector<2x32xf32>
    %368 = arith.addf %366, %367 : vector<2x32xf32>
    %369 = math.tanh %368 : vector<2x32xf32>
    %370 = arith.mulf %365, %369 : vector<2x32xf32>
    %371 = arith.truncf %370 : vector<2x32xf32> to vector<2x32xbf16>
    %cst_104 = arith.constant dense<0.000000e+00> : vector<2x128xf32>
    %372 = tpu.matmul %371, %8, %cst_104 {dimension_numbers = #tpu.dot_dimension_numbers<[1], [0], [0], [1], [0, 0, 1, 1], [], []>} : vector<2x32xbf16>, vector<32x128xbf16>, vector<2x128xf32> -> vector<2x128xf32>
    %373 = arith.addf %372, %12 : vector<2x128xf32>
    %374 = vector.extract_strided_slice %6 {offsets = [6, 0, 0], sizes = [1, 2, 128], strides = [1, 1, 1]} : vector<8x2x128xf32> to vector<1x2x128xf32>
    %375 = vector.shape_cast %374 : vector<1x2x128xf32> to vector<2x128xf32>
    %376 = arith.truncf %343 : vector<2x32xf32> to vector<2x32xbf16>
    %cst_105 = arith.constant dense<0.000000e+00> : vector<2x128xf32>
    %377 = tpu.matmul %376, %7, %cst_105 {dimension_numbers = #tpu.dot_dimension_numbers<[1], [0], [0], [1], [0, 0, 1, 1], [], []>} : vector<2x32xbf16>, vector<32x128xbf16>, vector<2x128xf32> -> vector<2x128xf32>
    %378 = arith.addf %375, %377 : vector<2x128xf32>
    %379 = vector.broadcast %21 : vector<1x128xf32> to vector<2x128xf32>
    %380 = arith.mulf %378, %379 : vector<2x128xf32>
    %381 = math.tanh %380 : vector<2x128xf32>
    %382 = vector.extract_strided_slice %381 {offsets = [0, 0], sizes = [2, 32], strides = [1, 1]} : vector<2x128xf32> to vector<2x32xf32>
    %cst_106 = arith.constant 5.000000e-01 : f32
    %383 = vector.broadcast %cst_106 : f32 to vector<2x32xf32>
    %384 = arith.mulf %383, %382 : vector<2x32xf32>
    %cst_107 = arith.constant 5.000000e-01 : f32
    %385 = vector.broadcast %cst_107 : f32 to vector<2x32xf32>
    %386 = arith.addf %385, %384 : vector<2x32xf32>
    %387 = vector.extract_strided_slice %381 {offsets = [0, 32], sizes = [2, 32], strides = [1, 1]} : vector<2x128xf32> to vector<2x32xf32>
    %cst_108 = arith.constant 5.000000e-01 : f32
    %388 = vector.broadcast %cst_108 : f32 to vector<2x32xf32>
    %389 = arith.mulf %388, %387 : vector<2x32xf32>
    %cst_109 = arith.constant 5.000000e-01 : f32
    %390 = vector.broadcast %cst_109 : f32 to vector<2x32xf32>
    %391 = arith.addf %390, %389 : vector<2x32xf32>
    %392 = vector.extract_strided_slice %381 {offsets = [0, 64], sizes = [2, 32], strides = [1, 1]} : vector<2x128xf32> to vector<2x32xf32>
    %393 = vector.extract_strided_slice %381 {offsets = [0, 96], sizes = [2, 32], strides = [1, 1]} : vector<2x128xf32> to vector<2x32xf32>
    %cst_110 = arith.constant 5.000000e-01 : f32
    %394 = vector.broadcast %cst_110 : f32 to vector<2x32xf32>
    %395 = arith.mulf %394, %393 : vector<2x32xf32>
    %cst_111 = arith.constant 5.000000e-01 : f32
    %396 = vector.broadcast %cst_111 : f32 to vector<2x32xf32>
    %397 = arith.addf %396, %395 : vector<2x32xf32>
    %398 = arith.mulf %391, %341 : vector<2x32xf32>
    %399 = arith.mulf %386, %392 : vector<2x32xf32>
    %400 = arith.addf %398, %399 : vector<2x32xf32>
    %401 = math.tanh %400 : vector<2x32xf32>
    %402 = arith.mulf %397, %401 : vector<2x32xf32>
    %403 = arith.truncf %402 : vector<2x32xf32> to vector<2x32xbf16>
    %cst_112 = arith.constant dense<0.000000e+00> : vector<2x128xf32>
    %404 = tpu.matmul %403, %9, %cst_112 {dimension_numbers = #tpu.dot_dimension_numbers<[1], [0], [0], [1], [0, 0, 1, 1], [], []>} : vector<2x32xbf16>, vector<32x128xbf16>, vector<2x128xf32> -> vector<2x128xf32>
    %405 = arith.addf %404, %373 : vector<2x128xf32>
    %406 = vector.broadcast %21 : vector<1x128xf32> to vector<2x128xf32>
    %407 = arith.mulf %405, %406 : vector<2x128xf32>
    %408 = math.tanh %407 : vector<2x128xf32>
    %409 = vector.extract_strided_slice %408 {offsets = [0, 0], sizes = [2, 32], strides = [1, 1]} : vector<2x128xf32> to vector<2x32xf32>
    %cst_113 = arith.constant 5.000000e-01 : f32
    %410 = vector.broadcast %cst_113 : f32 to vector<2x32xf32>
    %411 = arith.mulf %410, %409 : vector<2x32xf32>
    %cst_114 = arith.constant 5.000000e-01 : f32
    %412 = vector.broadcast %cst_114 : f32 to vector<2x32xf32>
    %413 = arith.addf %412, %411 : vector<2x32xf32>
    %414 = vector.extract_strided_slice %408 {offsets = [0, 32], sizes = [2, 32], strides = [1, 1]} : vector<2x128xf32> to vector<2x32xf32>
    %cst_115 = arith.constant 5.000000e-01 : f32
    %415 = vector.broadcast %cst_115 : f32 to vector<2x32xf32>
    %416 = arith.mulf %415, %414 : vector<2x32xf32>
    %cst_116 = arith.constant 5.000000e-01 : f32
    %417 = vector.broadcast %cst_116 : f32 to vector<2x32xf32>
    %418 = arith.addf %417, %416 : vector<2x32xf32>
    %419 = vector.extract_strided_slice %408 {offsets = [0, 64], sizes = [2, 32], strides = [1, 1]} : vector<2x128xf32> to vector<2x32xf32>
    %420 = vector.extract_strided_slice %408 {offsets = [0, 96], sizes = [2, 32], strides = [1, 1]} : vector<2x128xf32> to vector<2x32xf32>
    %cst_117 = arith.constant 5.000000e-01 : f32
    %421 = vector.broadcast %cst_117 : f32 to vector<2x32xf32>
    %422 = arith.mulf %421, %420 : vector<2x32xf32>
    %cst_118 = arith.constant 5.000000e-01 : f32
    %423 = vector.broadcast %cst_118 : f32 to vector<2x32xf32>
    %424 = arith.addf %423, %422 : vector<2x32xf32>
    %425 = arith.mulf %418, %368 : vector<2x32xf32>
    %426 = arith.mulf %413, %419 : vector<2x32xf32>
    %427 = arith.addf %425, %426 : vector<2x32xf32>
    %428 = math.tanh %427 : vector<2x32xf32>
    %429 = arith.mulf %424, %428 : vector<2x32xf32>
    %430 = arith.truncf %429 : vector<2x32xf32> to vector<2x32xbf16>
    %cst_119 = arith.constant dense<0.000000e+00> : vector<2x128xf32>
    %431 = tpu.matmul %430, %8, %cst_119 {dimension_numbers = #tpu.dot_dimension_numbers<[1], [0], [0], [1], [0, 0, 1, 1], [], []>} : vector<2x32xbf16>, vector<32x128xbf16>, vector<2x128xf32> -> vector<2x128xf32>
    %432 = arith.addf %431, %12 : vector<2x128xf32>
    %433 = vector.extract_strided_slice %6 {offsets = [7, 0, 0], sizes = [1, 2, 128], strides = [1, 1, 1]} : vector<8x2x128xf32> to vector<1x2x128xf32>
    %434 = vector.shape_cast %433 : vector<1x2x128xf32> to vector<2x128xf32>
    %435 = arith.truncf %402 : vector<2x32xf32> to vector<2x32xbf16>
    %cst_120 = arith.constant dense<0.000000e+00> : vector<2x128xf32>
    %436 = tpu.matmul %435, %7, %cst_120 {dimension_numbers = #tpu.dot_dimension_numbers<[1], [0], [0], [1], [0, 0, 1, 1], [], []>} : vector<2x32xbf16>, vector<32x128xbf16>, vector<2x128xf32> -> vector<2x128xf32>
    %437 = arith.addf %434, %436 : vector<2x128xf32>
    %438 = vector.broadcast %21 : vector<1x128xf32> to vector<2x128xf32>
    %439 = arith.mulf %437, %438 : vector<2x128xf32>
    %440 = math.tanh %439 : vector<2x128xf32>
    %441 = vector.extract_strided_slice %440 {offsets = [0, 0], sizes = [2, 32], strides = [1, 1]} : vector<2x128xf32> to vector<2x32xf32>
    %cst_121 = arith.constant 5.000000e-01 : f32
    %442 = vector.broadcast %cst_121 : f32 to vector<2x32xf32>
    %443 = arith.mulf %442, %441 : vector<2x32xf32>
    %cst_122 = arith.constant 5.000000e-01 : f32
    %444 = vector.broadcast %cst_122 : f32 to vector<2x32xf32>
    %445 = arith.addf %444, %443 : vector<2x32xf32>
    %446 = vector.extract_strided_slice %440 {offsets = [0, 32], sizes = [2, 32], strides = [1, 1]} : vector<2x128xf32> to vector<2x32xf32>
    %cst_123 = arith.constant 5.000000e-01 : f32
    %447 = vector.broadcast %cst_123 : f32 to vector<2x32xf32>
    %448 = arith.mulf %447, %446 : vector<2x32xf32>
    %cst_124 = arith.constant 5.000000e-01 : f32
    %449 = vector.broadcast %cst_124 : f32 to vector<2x32xf32>
    %450 = arith.addf %449, %448 : vector<2x32xf32>
    %451 = vector.extract_strided_slice %440 {offsets = [0, 64], sizes = [2, 32], strides = [1, 1]} : vector<2x128xf32> to vector<2x32xf32>
    %452 = vector.extract_strided_slice %440 {offsets = [0, 96], sizes = [2, 32], strides = [1, 1]} : vector<2x128xf32> to vector<2x32xf32>
    %cst_125 = arith.constant 5.000000e-01 : f32
    %453 = vector.broadcast %cst_125 : f32 to vector<2x32xf32>
    %454 = arith.mulf %453, %452 : vector<2x32xf32>
    %cst_126 = arith.constant 5.000000e-01 : f32
    %455 = vector.broadcast %cst_126 : f32 to vector<2x32xf32>
    %456 = arith.addf %455, %454 : vector<2x32xf32>
    %457 = arith.mulf %450, %400 : vector<2x32xf32>
    %458 = arith.mulf %445, %451 : vector<2x32xf32>
    %459 = arith.addf %457, %458 : vector<2x32xf32>
    %460 = math.tanh %459 : vector<2x32xf32>
    %461 = arith.mulf %456, %460 : vector<2x32xf32>
    %462 = arith.truncf %461 : vector<2x32xf32> to vector<2x32xbf16>
    %cst_127 = arith.constant dense<0.000000e+00> : vector<2x128xf32>
    %463 = tpu.matmul %462, %9, %cst_127 {dimension_numbers = #tpu.dot_dimension_numbers<[1], [0], [0], [1], [0, 0, 1, 1], [], []>} : vector<2x32xbf16>, vector<32x128xbf16>, vector<2x128xf32> -> vector<2x128xf32>
    %464 = arith.addf %463, %432 : vector<2x128xf32>
    %465 = vector.broadcast %21 : vector<1x128xf32> to vector<2x128xf32>
    %466 = arith.mulf %464, %465 : vector<2x128xf32>
    %467 = math.tanh %466 : vector<2x128xf32>
    %468 = vector.extract_strided_slice %467 {offsets = [0, 0], sizes = [2, 32], strides = [1, 1]} : vector<2x128xf32> to vector<2x32xf32>
    %cst_128 = arith.constant 5.000000e-01 : f32
    %469 = vector.broadcast %cst_128 : f32 to vector<2x32xf32>
    %470 = arith.mulf %469, %468 : vector<2x32xf32>
    %cst_129 = arith.constant 5.000000e-01 : f32
    %471 = vector.broadcast %cst_129 : f32 to vector<2x32xf32>
    %472 = arith.addf %471, %470 : vector<2x32xf32>
    %473 = vector.extract_strided_slice %467 {offsets = [0, 32], sizes = [2, 32], strides = [1, 1]} : vector<2x128xf32> to vector<2x32xf32>
    %cst_130 = arith.constant 5.000000e-01 : f32
    %474 = vector.broadcast %cst_130 : f32 to vector<2x32xf32>
    %475 = arith.mulf %474, %473 : vector<2x32xf32>
    %cst_131 = arith.constant 5.000000e-01 : f32
    %476 = vector.broadcast %cst_131 : f32 to vector<2x32xf32>
    %477 = arith.addf %476, %475 : vector<2x32xf32>
    %478 = vector.extract_strided_slice %467 {offsets = [0, 64], sizes = [2, 32], strides = [1, 1]} : vector<2x128xf32> to vector<2x32xf32>
    %479 = vector.extract_strided_slice %467 {offsets = [0, 96], sizes = [2, 32], strides = [1, 1]} : vector<2x128xf32> to vector<2x32xf32>
    %cst_132 = arith.constant 5.000000e-01 : f32
    %480 = vector.broadcast %cst_132 : f32 to vector<2x32xf32>
    %481 = arith.mulf %480, %479 : vector<2x32xf32>
    %cst_133 = arith.constant 5.000000e-01 : f32
    %482 = vector.broadcast %cst_133 : f32 to vector<2x32xf32>
    %483 = arith.addf %482, %481 : vector<2x32xf32>
    %484 = arith.mulf %477, %427 : vector<2x32xf32>
    %485 = arith.mulf %472, %478 : vector<2x32xf32>
    %486 = arith.addf %484, %485 : vector<2x32xf32>
    %487 = math.tanh %486 : vector<2x32xf32>
    %488 = arith.mulf %483, %487 : vector<2x32xf32>
    %489 = arith.truncf %488 : vector<2x32xf32> to vector<2x32xbf16>
    %c0_134 = arith.constant 0 : index
    %c0_135 = arith.constant 0 : index
    %490 = vector.load %arg7[%c0_134, %c0_135] : memref<32x1xbf16, #tpu.memory_space<vmem>>, vector<32x1xbf16>
    %cst_136 = arith.constant dense<0.000000e+00> : vector<2x1xf32>
    %491 = tpu.matmul %489, %490, %cst_136 {dimension_numbers = #tpu.dot_dimension_numbers<[1], [0], [0], [1], [0, 0, 1, 1], [], []>} : vector<2x32xbf16>, vector<32x1xbf16>, vector<2x1xf32> -> vector<2x1xf32>
    %c0_137 = arith.constant 0 : index
    %c0_138 = arith.constant 0 : index
    %492 = vector.load %arg8[%c0_137, %c0_138] : memref<1x1xf32, #tpu.memory_space<vmem>>, vector<1x1xf32>
    %493 = vector.broadcast %492 : vector<1x1xf32> to vector<2x1xf32>
    %494 = arith.addf %491, %493 : vector<2x1xf32>
    %c0_139 = arith.constant 0 : index
    %c0_140 = arith.constant 0 : index
    %495 = vector.load %arg9[%c0_139, %c0_140] : memref<2x1xf32, #tpu.memory_space<vmem>>, vector<2x1xf32>
    tpu.vector_store %arg9[%c0_139, %c0_140], %494 {strides = array<i32>} : memref<2x1xf32, #tpu.memory_space<vmem>>, vector<2x1xf32>,
    return
  }
}

</mosaic_0001>

<bundles_post_ra>
// kernel: tpu_custom_call.1
= control target key start
LH: loop header
LB: loop body
LE: loop exit
PB: predicated region body
PF: predicated region fallthrough
CT: control target
= control target key end

     0   :  { %s2498_s0 = inlined_call_operand.vmem [shape: bf16[16,4], index: 0, kind: input, shape index: {}]   ;;  %s2499_s1 = inlined_call_operand.vmem [shape: bf16[4,128], index: 1, kind: input, shape index: {}]   ;;  %s2500_s2 = inlined_call_operand.vmem [shape: bf16[32,128], index: 2, kind: input, shape index: {}]   ;;  %s2501_s3 = inlined_call_operand.vmem [shape: bf16[32,128], index: 3, kind: input, shape index: {}]   ;;  %s2502_s4 = inlined_call_operand.hbm [shape: bf16[32,128], index: 4, kind: input, shape index: {}]   ;;  %s2503_s5 = inlined_call_operand.vmem [shape: f32[1,128], index: 5, kind: input, shape index: {}]   ;;  %s2504_s6 = inlined_call_operand.vmem [shape: f32[1,128], index: 6, kind: input, shape index: {}]   ;;  %s2505_s7 = inlined_call_operand.vmem [shape: bf16[32,1], index: 7, kind: input, shape index: {}]   ;;  %s2506_s8 = inlined_call_operand.<no memory space> [shape: f32[1,1], index: 8, kind: input, shape index: {}]   ;;  %s2507_s9 = inlined_call_operand.vmem [shape: f32[2,1], index: 9, kind: output, shape index: {}]  }
   0x1   :  { %v14_v0 = vstv %s2506_s8 }
   0x2   :  { %15 = vst [vmem:[#allocation2] sm:$0x1] %v14_v0 }
   0x3   :  { %16 = vsyncpa [#allocation4], 0  ;;  %s2061_s11 = smov [#allocation3]   ;;  %s2037_s15 = scalar_lea.hbm %s2502_s4, 256 }
   0x4   :  { %s30_s12 = sshll.u32 %s2061_s11, 4  ;;  %p2038_p0 = scmp.ne.s32.totalorder %s2502_s4, %s2037_s15  ;;  %s31_s12 = int_to_ptr.vmem [resolvable:$true] %s30_s12 }
   0x5   :  { %p2041_p1 = scmp.lt.u32.totalorder %s2037_s15, %s2502_s4 }
   0x7   :  { %p2043_p2 = pnand %p2041_p1, %p2038_p0 }
   0x9   :  { %2046 = shalt.err (!%p2043_p2)
}
   0xa   :  { %s2047_s8 = scalar_lea.vmem %s31_s12, 256  ;;  %p2052_p4 = scmp.lt.s32.totalorder %s31_s12, %s31_s12 }
   0xb   :  { %p2048_p3 = scmp.ne.s32.totalorder %s31_s12, %s2047_s8  ;;  %p2053_p5 = scmp.lt.s32.totalorder %s2047_s8, %s2047_s8 }
   0xd   :  { %p2054_p6 = por %p2053_p5, %p2052_p4 }
   0xf   :  { %p2055_p7 = pnand %p2054_p6, %p2048_p3 }
  0x11   :  { %2058 = shalt.err (!%p2055_p7)
}
  0x12   :  { %s2062_s20 = smov 64   ;;  %s2063_s21 = smov 4  }
  0x13   :  { %36 = dma.hbm_to_vmem [thread:$0]  %s2502_s4, 256, %s31_s12, [#allocation4], %s2062_s20, %s2062_s20, %s2063_s21  }
  0x14   :  { %2059 = dma.done.wait [#allocation4], 256  }
  0x15   :  { %2060 = vsyncadd [#allocation4], 4294967040  ;;  %v2064_v1 = vmov 0.0   ;;  %vm2065_vm0 = vmmov 0   ;;  %vm68_vm1 = vcmask 1041408   ;;  %v1964_v4 = vld [vmem:[%s2498_s0] sm:$0xff]   ;;  %v119_v5 = vlaneseq }
  0x16   :  { %1731 = vmatprep.subr.bf16.mxu0 %v2064_v1  ;;  %1733 = vmatprep.mubr.msk.bf16.mxu0 %vm2065_vm0, %v2064_v1  ;;  %v51_v2 = vld [vmem:[%s2499_s1] sm:$0x3]  ;;  %vm64_vm2 = vcmask 31744   ;;  %v2066_v6 = vmov 1983009808   ;;  %v2067_v16 = vmov 0.5  }
  0x17   :  { %1737 = vmatprep.subr.bf16.mxu1 %v2064_v1  ;;  %1741 = vmatprep.mubr.msk.bf16.mxu1 %vm2065_vm0, %v2064_v1  ;;  %v70_v3 = vsel %vm68_vm1, %v51_v2, 0  ;;  %v117_v7 = vunpack.c.l.s4 %v2066_v6  ;;  %v177_v8 = vand.u32 127, %v119_v5  ;;  %v120_v10 = vshrl.u32 %v119_v5, 7  ;;  %v1624_v11 = vld [vmem:[%s2503_s5] ss:$0 sm:$0xff]  ;;  %s2068_s0 = smov 32  }
  0x18   :  { %1732 = vmatpush3.bf16.msra.mxu0 %v70_v3  ;;  %v2168_v36 = vld [vmem:[%s2501_s3] sm:$0xff]   ;;  %v2174_v37 = vld [vmem:[%s2501_s3 + $0x8] sm:$0xff]   ;;  %vm219_vm6 = vcmask 261120   ;;  %vm1617_vm7 = vcmask 1024  }
  0x19   :  { %1745 = vmatprep.subr.bf16.mxu0 %v2064_v1  ;;  %v118_v9 = vunpack.c.0.s8 %v117_v7  ;;  %vm178_vm3 = vcmp.ge.s32.totalorder %v177_v8, 64  ;;  %vm179_vm4 = vcmp.lt.s32.totalorder %v177_v8, 96  ;;  %1738 = vmatpush3.bf16.msra.mxu1 %v2168_v36  ;;  %v2184_v42 = vld [vmem:[%s2500_s2] sm:$0xff]   ;;  %v2191_v44 = vld [vmem:[%s2500_s2 + $0x8] sm:$0xff]  }
  0x1a   :  { %vm180_vm5 = vmand %vm178_vm3, %vm179_vm4  ;;  %1739 = vmatprep.subr.bf16.mxu1 %v2064_v1  ;;  %v2204_v45 = vld [vmem:[%s2504_s6] ss:$0 sm:$0xff] }
  0x1b   :  { %1734 = vmatmul.mubr.msk.bf16.vlgmr.msra.gmra.mrb[0].mxu0 %vm64_vm2, %v1964_v4  ;;  %v121_v12 = vsub.s32 %v118_v9, %v120_v10  ;;  %v2154_v17 = vsel %vm180_vm5, 1.0, %v2067_v16 }
  0x1c   :  { %1749 = vmatprep.mubr.msk.bf16.mxu0 %vm2065_vm0, %v2064_v1 }
  0x1d   :  { %1740 = vmatpush3.bf16.msra.mxu1 %v2174_v37 }
  0x1e   :  { %1753 = vmatprep.subr.bf16.mxu1 %v2064_v1 }
  0xee   :  { %v106_v13 = vpop.f32.mrb[0].mxu0 }
  0xef   :  { %v107_v14 = vadd.f32 %v1624_v11, %v106_v13  ;;  %v1735_v15 = vpop.f32.mrb[1].mxu0  ;;  %v2219_v13 = vld [vmem:[#allocation3] sm:$0xff]  }
  0xf0   :  { %v109_v18 = vpop.f32.mrb[2].mxu0  ;;  %1746 = vmatpush3.bf16.msra.mxu0 %v2219_v13 }
  0xf1   :  { %v115_v19 = vcombine.high %v107_v14, %v107_v14  ;;  %v122_v20 = vrot.slane %v107_v14, %v121_v12  ;;  %v110_v21 = vadd.f32 %v1624_v11, %v109_v18  ;;  %v1736_v22 = vpop.f32.mrb[3].mxu0  ;;  %v2223_v14 = vld [vmem:[#allocation3 + $0x8] sm:$0xff]   ;;  %1747 = vmatprep.subr.bf16.mxu0 %v2064_v1 }
  0xf3   :  { %v182_v23 = vmul.f32 %v2154_v17, %v122_v20  ;;  %v132_v24 = vcombine.high %v110_v21, %v110_v21  ;;  %v2157_v25 = vrot.slane %v115_v19, %v121_v12  ;;  %v2159_v26 = vrot.slane %v110_v21, %v121_v12 }
  0xf4   :  { %v130_v52 = vcombine.high %v122_v20, %v122_v20  ;;  %1748 = vmatpush3.bf16.msra.mxu0 %v2223_v14 }
  0xf5   :  { %1973 = vtanh.f32 %v182_v23  ;;  %v2161_v27 = vrot.slane %v132_v24, %v121_v12  ;;  %1761 = vmatprep.subr.bf16.mxu0 %v2064_v1 }
  0xff   :  { %v1974_v28 = vpop.eup %1973 }
 0x100   :  { %188 = vrot.lane.b32.xlu0 %v1974_v28, %s2062_s20  ;;  %v184_v29 = vmul.f32 0.5, %v1974_v28 }
 0x102   :  { %v185_v30 = vadd.f32 0.5, %v184_v29 }
 0x104   :  { %v186_v33 = vmul.f32 0.0, %v185_v30 }
 0x172   :  { %v189_v31 = vpop.permute.xlu0 %188 }
 0x173   :  { %v191_v32 = vmul.f32 %v189_v31, %v185_v30 }
 0x175   :  { %193 = vrot.lane.b32.xlu0 %v191_v32, %s2068_s0 }
 0x1e7   :  { %v194_v34 = vpop.permute.xlu0 %193 }
 0x1e8   :  { %v196_v35 = vadd.f32 %v194_v34, %v186_v33 }
 0x1ea   :  { %1975 = vtanh.f32 %v196_v35 }
 0x1f4   :  { %v1976_v38 = vpop.eup %1975 }
 0x1f5   :  { %199 = vrot.lane.b32.xlu1 %v1976_v38, %s2062_s20 }
 0x267   :  { %v200_v39 = vpop.permute.xlu1 %199 }
 0x268   :  { %v202_v40 = vmul.f32 %v200_v39, %v185_v30 }
 0x26a   :  { %v203_v41 = vpack.c.bf16 %v202_v40, %v202_v40 }
 0x26c   :  { %205 = vrot.lane.b32.xlu1 %v203_v41, %s2068_s0 }
 0x2de   :  { %v206_v43 = vpop.permute.xlu1 %205 }
 0x2df   :  { %1742 = vmatmul.mubr.msk.bf16.vlgmr.msra.gmra.mrb[0].mxu1 %vm219_vm6, %v206_v43 }
 0x2e0   :  { %1754 = vmatpush3.bf16.msra.mxu1 %v2184_v42  ;;  %1757 = vmatprep.mubr.msk.bf16.mxu1 %vm2065_vm0, %v2064_v1 }
 0x2e1   :  { %1755 = vmatprep.subr.bf16.mxu1 %v2064_v1 }
 0x2e4   :  { %1756 = vmatpush3.bf16.msra.mxu1 %v2191_v44 }
 0x2e5   :  { %1769 = vmatprep.subr.bf16.mxu1 %v2064_v1 }
 0x2e7   :  { %1758 = vmatmul.mubr.msk.bf16.vlgmr.msra.gmra.mrb[4].mxu1 %vm219_vm6, %v206_v43 }
 0x2e8   :  { %1773 = vmatprep.mubr.msk.bf16.mxu1 %vm2065_vm0, %v2064_v1  ;;  %1770 = vmatpush3.bf16.msra.mxu1 %v2219_v13 }
 0x2e9   :  { %1771 = vmatprep.subr.bf16.mxu1 %v2064_v1 }
 0x2ec   :  { %1772 = vmatpush3.bf16.msra.mxu1 %v2223_v14 }
 0x2ed   :  { %1785 = vmatprep.subr.bf16.mxu1 %v2064_v1 }
 0x3b2   :  { %v257_v46 = vpop.f32.mrb[0].mxu1 }
 0x3b3   :  { %v258_v47 = vadd.f32 %v2204_v45, %v257_v46  ;;  %v1743_v48 = vpop.f32.mrb[1].mxu1 }
 0x3b4   :  { %v260_v49 = vpop.f32.mrb[2].mxu1 }
 0x3b5   :  { %v263_v50 = vmul.f32 %v258_v47, %v2154_v17  ;;  %v1744_v51 = vpop.f32.mrb[3].mxu1 }
 0x3b7   :  { %1977 = vtanh.f32 %v263_v50 }
 0x3ba   :  { %v389_v53 = vpop.f32.mrb[4].mxu1 }
 0x3bb   :  { %v395_v54 = vadd.f32 %v389_v53, %v130_v52  ;;  %v1759_v55 = vpop.f32.mrb[5].mxu1 }
 0x3bc   :  { %v392_v56 = vpop.f32.mrb[6].mxu1 }
 0x3bd   :  { %v396_v57 = vmul.f32 %v395_v54, %v2154_v17  ;;  %v1760_v58 = vpop.f32.mrb[7].mxu1 }
 0x3bf   :  { %1979 = vtanh.f32 %v396_v57 }
 0x3c1   :  { %v1978_v59 = vpop.eup %1977 }
 0x3c2   :  { %269 = vrot.lane.b32.xlu0 %v1978_v59, %s2062_s20  ;;  %v265_v61 = vmul.f32 0.5, %v1978_v59 }
 0x3c4   :  { %v266_v62 = vadd.f32 0.5, %v265_v61 }
 0x3c6   :  { %v267_v6 = vmul.f32 0.0, %v266_v62 }
 0x3c9   :  { %v1980_v60 = vpop.eup %1979 }
 0x3ca   :  { %402 = vrot.lane.b32.xlu1 %v1980_v60, %s2062_s20  ;;  %v398_v2 = vmul.f32 0.5, %v1980_v60 }
 0x3cc   :  { %v399_v3 = vadd.f32 0.5, %v398_v2 }
 0x3ce   :  { %v400_v9 = vmul.f32 %v399_v3, %v196_v35 }
 0x434   :  { %v270_v63 = vpop.permute.xlu0 %269 }
 0x435   :  { %v272_v0 = vmul.f32 %v270_v63, %v266_v62 }
 0x437   :  { %274 = vrot.lane.b32.xlu0 %v272_v0, %s2068_s0 }
 0x43c   :  { %v403_v4 = vpop.permute.xlu1 %402 }
 0x43d   :  { %v405_v5 = vmul.f32 %v403_v4, %v399_v3 }
 0x43f   :  { %407 = vrot.lane.b32.xlu1 %v405_v5, %s2068_s0 }
 0x4a9   :  { %v275_v7 = vpop.permute.xlu0 %274 }
 0x4aa   :  { %v2213_v8 = vadd.f32 %v275_v7, %v267_v6 }
 0x4ac   :  { %1981 = vtanh.f32 %v2213_v8 }
 0x4b1   :  { %v408_v10 = vpop.permute.xlu1 %407 }
 0x4b2   :  { %v2216_v11 = vadd.f32 %v408_v10, %v400_v9 }
 0x4b4   :  { %1983 = vtanh.f32 %v2216_v11 }
 0x4b6   :  { %v1982_v12 = vpop.eup %1981 }
 0x4b7   :  { %280 = vrot.lane.b32.xlu0 %v1982_v12, %s2062_s20 }
 0x4be   :  { %v1984_v15 = vpop.eup %1983 }
 0x4bf   :  { %413 = vrot.lane.b32.xlu1 %v1984_v15, %s2062_s20 }
 0x529   :  { %v281_v16 = vpop.permute.xlu0 %280 }
 0x52a   :  { %v283_v18 = vmul.f32 %v281_v16, %v266_v62  ;;  %v131_v16 = vcombine.high %v2157_v25, %v2157_v25 }
 0x52c   :  { %v284_v19 = vpack.c.bf16 %v283_v18, %v283_v18 }
 0x52e   :  { %286 = vrot.lane.b32.xlu0 %v284_v19, %s2068_s0 }
 0x531   :  { %v414_v20 = vpop.permute.xlu1 %413 }
 0x532   :  { %v416_v21 = vmul.f32 %v414_v20, %v399_v3 }
 0x534   :  { %v417_v22 = vpack.c.bf16 %v416_v21, %v416_v21 }
 0x536   :  { %419 = vrot.lane.b32.xlu1 %v417_v22, %s2068_s0 }
 0x5a0   :  { %v287_v23 = vpop.permute.xlu0 %286 }
 0x5a1   :  { %1750 = vmatmul.mubr.msk.bf16.vlgmr.msra.gmra.mrb[4].mxu0 %vm219_vm6, %v287_v23 }
 0x5a2   :  { %1762 = vmatpush3.bf16.msra.mxu0 %v2168_v36  ;;  %1765 = vmatprep.mubr.msk.bf16.mxu0 %vm2065_vm0, %v2064_v1 }
 0x5a3   :  { %1763 = vmatprep.subr.bf16.mxu0 %v2064_v1 }
 0x5a6   :  { %1764 = vmatpush3.bf16.msra.mxu0 %v2174_v37 }
 0x5a7   :  { %1777 = vmatprep.subr.bf16.mxu0 %v2064_v1 }
 0x5a8   :  { %v420_v24 = vpop.permute.xlu1 %419 }
 0x5ad   :  { %1766 = vmatmul.mubr.msk.bf16.vlgmr.msra.gmra.mrb[4].mxu0 %vm219_vm6, %v420_v24 }
 0x5ae   :  { %1778 = vmatpush3.bf16.msra.mxu0 %v2184_v42  ;;  %1781 = vmatprep.mubr.msk.bf16.mxu0 %vm2065_vm0, %v2064_v1 }
 0x5af   :  { %1779 = vmatprep.subr.bf16.mxu0 %v2064_v1 }
 0x5b2   :  { %1780 = vmatpush3.bf16.msra.mxu0 %v2191_v44 }
 0x5b3   :  { %1793 = vmatprep.subr.bf16.mxu0 %v2064_v1 }
 0x5b5   :  { %1782 = vmatmul.mubr.msk.bf16.vlgmr.msra.gmra.mrb[8].mxu0 %vm219_vm6, %v420_v24 }
 0x5b6   :  { %1794 = vmatpush3.bf16.msra.mxu0 %v2219_v13  ;;  %1797 = vmatprep.mubr.msk.bf16.mxu0 %vm2065_vm0, %v2064_v1 }
 0x5b7   :  { %1795 = vmatprep.subr.bf16.mxu0 %v2064_v1 }
 0x5ba   :  { %1796 = vmatpush3.bf16.msra.mxu0 %v2223_v14 }
 0x5bb   :  { %1809 = vmatprep.subr.bf16.mxu0 %v2064_v1 }
 0x680   :  { %v458_v28 = vpop.f32.mrb[4].mxu0 }
 0x681   :  { %v1921_v29 = vadd.f32 %v2204_v45, %v458_v28  ;;  %v1767_v30 = vpop.f32.mrb[5].mxu0 }
 0x682   :  { %v461_v31 = vpop.f32.mrb[6].mxu0 }
 0x683   :  { %v464_v32 = vmul.f32 %v1921_v29, %v2154_v17  ;;  %v1768_v33 = vpop.f32.mrb[7].mxu0 }
 0x685   :  { %1985 = vtanh.f32 %v464_v32 }
 0x688   :  { %v566_v34 = vpop.f32.mrb[8].mxu0 }
 0x689   :  { %v572_v35 = vadd.f32 %v566_v34, %v2157_v25  ;;  %v1783_v38 = vpop.f32.mrb[9].mxu0 }
 0x68a   :  { %v569_v39 = vpop.f32.mrb[10].mxu0 }
 0x68b   :  { %v573_v40 = vmul.f32 %v572_v35, %v2154_v17  ;;  %v1784_v41 = vpop.f32.mrb[11].mxu0 }
 0x68d   :  { %1987 = vtanh.f32 %v573_v40 }
 0x68f   :  { %v1986_v43 = vpop.eup %1985 }
 0x690   :  { %470 = vrot.lane.b32.xlu0 %v1986_v43, %s2062_s20  ;;  %v466_v47 = vmul.f32 0.5, %v1986_v43 }
 0x692   :  { %v467_v48 = vadd.f32 0.5, %v466_v47 }
 0x694   :  { %v468_v55 = vmul.f32 %v467_v48, %v2213_v8 }
 0x697   :  { %v1988_v46 = vpop.eup %1987 }
 0x698   :  { %579 = vrot.lane.b32.xlu1 %v1988_v46, %s2062_s20  ;;  %v575_v51 = vmul.f32 0.5, %v1988_v46 }
 0x69a   :  { %v576_v52 = vadd.f32 0.5, %v575_v51 }
 0x69c   :  { %v577_v58 = vmul.f32 %v576_v52, %v2216_v11 }
 0x702   :  { %v471_v49 = vpop.permute.xlu0 %470 }
 0x703   :  { %v473_v50 = vmul.f32 %v471_v49, %v467_v48 }
 0x705   :  { %475 = vrot.lane.b32.xlu0 %v473_v50, %s2068_s0 }
 0x70a   :  { %v580_v53 = vpop.permute.xlu1 %579 }
 0x70b   :  { %v582_v54 = vmul.f32 %v580_v53, %v576_v52 }
 0x70d   :  { %584 = vrot.lane.b32.xlu1 %v582_v54, %s2068_s0 }
 0x777   :  { %v476_v56 = vpop.permute.xlu0 %475 }
 0x778   :  { %v2265_v57 = vadd.f32 %v476_v56, %v468_v55 }
 0x77a   :  { %1989 = vtanh.f32 %v2265_v57 }
 0x77f   :  { %v585_v59 = vpop.permute.xlu1 %584 }
 0x780   :  { %v2269_v60 = vadd.f32 %v585_v59, %v577_v58 }
 0x782   :  { %1991 = vtanh.f32 %v2269_v60 }
 0x784   :  { %v1990_v61 = vpop.eup %1989 }
 0x785   :  { %481 = vrot.lane.b32.xlu0 %v1990_v61, %s2062_s20 }
 0x78c   :  { %v1992_v62 = vpop.eup %1991 }
 0x78d   :  { %590 = vrot.lane.b32.xlu1 %v1992_v62, %s2062_s20 }
 0x7f7   :  { %v482_v63 = vpop.permute.xlu0 %481 }
 0x7f8   :  { %v484_v0 = vmul.f32 %v482_v63, %v467_v48 }
 0x7fa   :  { %v485_v2 = vpack.c.bf16 %v484_v0, %v484_v0 }
 0x7fc   :  { %487 = vrot.lane.b32.xlu0 %v485_v2, %s2068_s0 }
 0x7ff   :  { %v591_v3 = vpop.permute.xlu1 %590 }
 0x800   :  { %v593_v4 = vmul.f32 %v591_v3, %v576_v52 }
 0x802   :  { %v594_v5 = vpack.c.bf16 %v593_v4, %v593_v4 }
 0x804   :  { %596 = vrot.lane.b32.xlu1 %v594_v5, %s2068_s0 }
 0x86e   :  { %v488_v6 = vpop.permute.xlu0 %487 }
 0x86f   :  { %1774 = vmatmul.mubr.msk.bf16.vlgmr.msra.gmra.mrb[8].mxu1 %vm219_vm6, %v488_v6 }
 0x870   :  { %1786 = vmatpush3.bf16.msra.mxu1 %v2168_v36  ;;  %1789 = vmatprep.mubr.msk.bf16.mxu1 %vm2065_vm0, %v2064_v1 }
 0x871   :  { %1787 = vmatprep.subr.bf16.mxu1 %v2064_v1 }
 0x874   :  { %1788 = vmatpush3.bf16.msra.mxu1 %v2174_v37 }
 0x875   :  { %1801 = vmatprep.subr.bf16.mxu1 %v2064_v1 }
 0x876   :  { %v597_v7 = vpop.permute.xlu1 %596 }
 0x87b   :  { %1790 = vmatmul.mubr.msk.bf16.vlgmr.msra.gmra.mrb[8].mxu1 %vm219_vm6, %v597_v7 }
 0x87c   :  { %1802 = vmatpush3.bf16.msra.mxu1 %v2184_v42  ;;  %1805 = vmatprep.mubr.msk.bf16.mxu1 %vm2065_vm0, %v2064_v1 }
 0x87d   :  { %1803 = vmatprep.subr.bf16.mxu1 %v2064_v1 }
 0x880   :  { %1804 = vmatpush3.bf16.msra.mxu1 %v2191_v44 }
 0x881   :  { %1817 = vmatprep.subr.bf16.mxu1 %v2064_v1 }
 0x883   :  { %1806 = vmatmul.mubr.msk.bf16.vlgmr.msra.gmra.mrb[12].mxu1 %vm219_vm6, %v597_v7 }
 0x884   :  { %1818 = vmatpush3.bf16.msra.mxu1 %v2219_v13  ;;  %1821 = vmatprep.mubr.msk.bf16.mxu1 %vm2065_vm0, %v2064_v1 }
 0x885   :  { %1819 = vmatprep.subr.bf16.mxu1 %v2064_v1 }
 0x888   :  { %1820 = vmatpush3.bf16.msra.mxu1 %v2223_v14 }
 0x889   :  { %1833 = vmatprep.subr.bf16.mxu1 %v2064_v1 }
 0x94e   :  { %v635_v8 = vpop.f32.mrb[8].mxu1 }
 0x94f   :  { %v1922_v9 = vadd.f32 %v2204_v45, %v635_v8  ;;  %v1791_v10 = vpop.f32.mrb[9].mxu1 }
 0x950   :  { %v638_v11 = vpop.f32.mrb[10].mxu1 }
 0x951   :  { %v641_v12 = vmul.f32 %v1922_v9, %v2154_v17  ;;  %v1792_v15 = vpop.f32.mrb[11].mxu1 }
 0x953   :  { %1993 = vtanh.f32 %v641_v12 }
 0x956   :  { %v743_v18 = vpop.f32.mrb[12].mxu1 }
 0x957   :  { %v749_v19 = vadd.f32 %v743_v18, %v131_v16  ;;  %v1807_v20 = vpop.f32.mrb[13].mxu1 }
 0x958   :  { %v746_v21 = vpop.f32.mrb[14].mxu1 }
 0x959   :  { %v750_v22 = vmul.f32 %v749_v19, %v2154_v17  ;;  %v1808_v23 = vpop.f32.mrb[15].mxu1 }
 0x95b   :  { %1995 = vtanh.f32 %v750_v22 }
 0x95d   :  { %v1994_v24 = vpop.eup %1993 }
 0x95e   :  { %647 = vrot.lane.b32.xlu0 %v1994_v24, %s2062_s20  ;;  %v643_v29 = vmul.f32 0.5, %v1994_v24 }
 0x960   :  { %v644_v30 = vadd.f32 0.5, %v643_v29 }
 0x962   :  { %v645_v38 = vmul.f32 %v644_v30, %v2265_v57 }
 0x965   :  { %v1996_v28 = vpop.eup %1995 }
 0x966   :  { %756 = vrot.lane.b32.xlu1 %v1996_v28, %s2062_s20  ;;  %v752_v25 = vmul.f32 0.5, %v1996_v28 }
 0x968   :  { %v753_v33 = vadd.f32 0.5, %v752_v25 }
 0x96a   :  { %v754_v41 = vmul.f32 %v753_v33, %v2269_v60 }
 0x9d0   :  { %v648_v31 = vpop.permute.xlu0 %647 }
 0x9d1   :  { %v650_v32 = vmul.f32 %v648_v31, %v644_v30 }
 0x9d3   :  { %652 = vrot.lane.b32.xlu0 %v650_v32, %s2068_s0 }
 0x9d8   :  { %v757_v34 = vpop.permute.xlu1 %756 }
 0x9d9   :  { %v759_v35 = vmul.f32 %v757_v34, %v753_v33 }
 0x9db   :  { %761 = vrot.lane.b32.xlu1 %v759_v35, %s2068_s0 }
 0xa45   :  { %v653_v39 = vpop.permute.xlu0 %652 }
 0xa46   :  { %v2307_v40 = vadd.f32 %v653_v39, %v645_v38 }
 0xa48   :  { %1997 = vtanh.f32 %v2307_v40 }
 0xa4d   :  { %v762_v43 = vpop.permute.xlu1 %761 }
 0xa4e   :  { %v2311_v46 = vadd.f32 %v762_v43, %v754_v41 }
 0xa50   :  { %1999 = vtanh.f32 %v2311_v46 }
 0xa52   :  { %v1998_v47 = vpop.eup %1997 }
 0xa53   :  { %658 = vrot.lane.b32.xlu0 %v1998_v47, %s2062_s20 }
 0xa5a   :  { %v2000_v48 = vpop.eup %1999 }
 0xa5b   :  { %767 = vrot.lane.b32.xlu1 %v2000_v48, %s2062_s20  ;;  %v147_v48 = vcombine.high %v2159_v26, %v2159_v26 }
 0xac5   :  { %v659_v49 = vpop.permute.xlu0 %658 }
 0xac6   :  { %v661_v50 = vmul.f32 %v659_v49, %v644_v30 }
 0xac8   :  { %v662_v51 = vpack.c.bf16 %v661_v50, %v661_v50 }
 0xaca   :  { %664 = vrot.lane.b32.xlu0 %v662_v51, %s2068_s0 }
 0xacd   :  { %v768_v52 = vpop.permute.xlu1 %767 }
 0xace   :  { %v770_v53 = vmul.f32 %v768_v52, %v753_v33 }
 0xad0   :  { %v771_v54 = vpack.c.bf16 %v770_v53, %v770_v53 }
 0xad2   :  { %773 = vrot.lane.b32.xlu1 %v771_v54, %s2068_s0 }
 0xb3c   :  { %v665_v55 = vpop.permute.xlu0 %664 }
 0xb3d   :  { %1798 = vmatmul.mubr.msk.bf16.vlgmr.msra.gmra.mrb[12].mxu0 %vm219_vm6, %v665_v55 }
 0xb3e   :  { %1810 = vmatpush3.bf16.msra.mxu0 %v2168_v36  ;;  %1813 = vmatprep.mubr.msk.bf16.mxu0 %vm2065_vm0, %v2064_v1 }
 0xb3f   :  { %1811 = vmatprep.subr.bf16.mxu0 %v2064_v1 }
 0xb42   :  { %1812 = vmatpush3.bf16.msra.mxu0 %v2174_v37 }
 0xb43   :  { %1825 = vmatprep.subr.bf16.mxu0 %v2064_v1 }
 0xb44   :  { %v774_v56 = vpop.permute.xlu1 %773 }
 0xb49   :  { %1814 = vmatmul.mubr.msk.bf16.vlgmr.msra.gmra.mrb[12].mxu0 %vm219_vm6, %v774_v56 }
 0xb4a   :  { %1826 = vmatpush3.bf16.msra.mxu0 %v2184_v42  ;;  %1829 = vmatprep.mubr.msk.bf16.mxu0 %vm2065_vm0, %v2064_v1 }
 0xb4b   :  { %1827 = vmatprep.subr.bf16.mxu0 %v2064_v1 }
 0xb4e   :  { %1828 = vmatpush3.bf16.msra.mxu0 %v2191_v44 }
 0xb4f   :  { %1841 = vmatprep.subr.bf16.mxu0 %v2064_v1 }
 0xb51   :  { %1830 = vmatmul.mubr.msk.bf16.vlgmr.msra.gmra.mrb[16].mxu0 %vm219_vm6, %v774_v56 }
 0xb52   :  { %1842 = vmatpush3.bf16.msra.mxu0 %v2219_v13  ;;  %1845 = vmatprep.mubr.msk.bf16.mxu0 %vm2065_vm0, %v2064_v1 }
 0xb53   :  { %1843 = vmatprep.subr.bf16.mxu0 %v2064_v1 }
 0xb56   :  { %1844 = vmatpush3.bf16.msra.mxu0 %v2223_v14 }
 0xb57   :  { %1857 = vmatprep.subr.bf16.mxu0 %v2064_v1 }
 0xc1c   :  { %v812_v57 = vpop.f32.mrb[12].mxu0 }
 0xc1d   :  { %v1923_v58 = vadd.f32 %v2204_v45, %v812_v57  ;;  %v1815_v59 = vpop.f32.mrb[13].mxu0 }
 0xc1e   :  { %v815_v60 = vpop.f32.mrb[14].mxu0 }
 0xc1f   :  { %v818_v61 = vmul.f32 %v1923_v58, %v2154_v17  ;;  %v1816_v62 = vpop.f32.mrb[15].mxu0 }
 0xc21   :  { %2001 = vtanh.f32 %v818_v61 }
 0xc24   :  { %v920_v63 = vpop.f32.mrb[16].mxu0 }
 0xc25   :  { %v926_v0 = vadd.f32 %v920_v63, %v2159_v26  ;;  %v1831_v2 = vpop.f32.mrb[17].mxu0 }
 0xc26   :  { %v923_v3 = vpop.f32.mrb[18].mxu0 }
 0xc27   :  { %v927_v4 = vmul.f32 %v926_v0, %v2154_v17  ;;  %v1832_v5 = vpop.f32.mrb[19].mxu0 }
 0xc29   :  { %2003 = vtanh.f32 %v927_v4 }
 0xc2b   :  { %v2002_v6 = vpop.eup %2001 }
 0xc2c   :  { %824 = vrot.lane.b32.xlu0 %v2002_v6, %s2062_s20  ;;  %v820_v8 = vmul.f32 0.5, %v2002_v6 }
 0xc2e   :  { %v821_v9 = vadd.f32 0.5, %v820_v8 }
 0xc30   :  { %v822_v19 = vmul.f32 %v821_v9, %v2307_v40 }
 0xc33   :  { %v2004_v7 = vpop.eup %2003 }
 0xc34   :  { %933 = vrot.lane.b32.xlu1 %v2004_v7, %s2062_s20  ;;  %v929_v12 = vmul.f32 0.5, %v2004_v7 }
 0xc36   :  { %v930_v15 = vadd.f32 0.5, %v929_v12 }
 0xc38   :  { %v931_v22 = vmul.f32 %v930_v15, %v2311_v46 }
 0xc9e   :  { %v825_v10 = vpop.permute.xlu0 %824 }
 0xc9f   :  { %v827_v11 = vmul.f32 %v825_v10, %v821_v9 }
 0xca1   :  { %829 = vrot.lane.b32.xlu0 %v827_v11, %s2068_s0 }
 0xca6   :  { %v934_v16 = vpop.permute.xlu1 %933 }
 0xca7   :  { %v936_v18 = vmul.f32 %v934_v16, %v930_v15 }
 0xca9   :  { %938 = vrot.lane.b32.xlu1 %v936_v18, %s2068_s0 }
 0xd13   :  { %v830_v20 = vpop.permute.xlu0 %829 }
 0xd14   :  { %v2348_v21 = vadd.f32 %v830_v20, %v822_v19 }
 0xd16   :  { %2005 = vtanh.f32 %v2348_v21 }
 0xd1b   :  { %v939_v23 = vpop.permute.xlu1 %938 }
 0xd1c   :  { %v2352_v24 = vadd.f32 %v939_v23, %v931_v22 }
 0xd1e   :  { %2007 = vtanh.f32 %v2352_v24 }
 0xd20   :  { %v2006_v28 = vpop.eup %2005 }
 0xd21   :  { %835 = vrot.lane.b32.xlu0 %v2006_v28, %s2062_s20 }
 0xd28   :  { %v2008_v29 = vpop.eup %2007 }
 0xd29   :  { %944 = vrot.lane.b32.xlu1 %v2008_v29, %s2062_s20 }
 0xd93   :  { %v836_v30 = vpop.permute.xlu0 %835 }
 0xd94   :  { %v838_v31 = vmul.f32 %v836_v30, %v821_v9 }
 0xd96   :  { %v839_v32 = vpack.c.bf16 %v838_v31, %v838_v31 }
 0xd98   :  { %841 = vrot.lane.b32.xlu0 %v839_v32, %s2068_s0 }
 0xd9b   :  { %v945_v25 = vpop.permute.xlu1 %944 }
 0xd9c   :  { %v947_v33 = vmul.f32 %v945_v25, %v930_v15 }
 0xd9e   :  { %v948_v34 = vpack.c.bf16 %v947_v33, %v947_v33 }
 0xda0   :  { %950 = vrot.lane.b32.xlu1 %v948_v34, %s2068_s0 }
 0xe0a   :  { %v842_v35 = vpop.permute.xlu0 %841 }
 0xe0b   :  { %1822 = vmatmul.mubr.msk.bf16.vlgmr.msra.gmra.mrb[16].mxu1 %vm219_vm6, %v842_v35 }
 0xe0c   :  { %1834 = vmatpush3.bf16.msra.mxu1 %v2168_v36  ;;  %1837 = vmatprep.mubr.msk.bf16.mxu1 %vm2065_vm0, %v2064_v1 }
 0xe0d   :  { %1835 = vmatprep.subr.bf16.mxu1 %v2064_v1 }
 0xe10   :  { %1836 = vmatpush3.bf16.msra.mxu1 %v2174_v37 }
 0xe11   :  { %1849 = vmatprep.subr.bf16.mxu1 %v2064_v1 }
 0xe12   :  { %v951_v38 = vpop.permute.xlu1 %950 }
 0xe17   :  { %1838 = vmatmul.mubr.msk.bf16.vlgmr.msra.gmra.mrb[16].mxu1 %vm219_vm6, %v951_v38 }
 0xe18   :  { %1850 = vmatpush3.bf16.msra.mxu1 %v2184_v42  ;;  %1853 = vmatprep.mubr.msk.bf16.mxu1 %vm2065_vm0, %v2064_v1 }
 0xe19   :  { %1851 = vmatprep.subr.bf16.mxu1 %v2064_v1 }
 0xe1c   :  { %1852 = vmatpush3.bf16.msra.mxu1 %v2191_v44 }
 0xe1d   :  { %1865 = vmatprep.subr.bf16.mxu1 %v2064_v1 }
 0xe1f   :  { %1854 = vmatmul.mubr.msk.bf16.vlgmr.msra.gmra.mrb[20].mxu1 %vm219_vm6, %v951_v38 }
 0xe20   :  { %1866 = vmatpush3.bf16.msra.mxu1 %v2219_v13  ;;  %1869 = vmatprep.mubr.msk.bf16.mxu1 %vm2065_vm0, %v2064_v1 }
 0xe21   :  { %1867 = vmatprep.subr.bf16.mxu1 %v2064_v1 }
 0xe24   :  { %1868 = vmatpush3.bf16.msra.mxu1 %v2223_v14 }
 0xe25   :  { %1881 = vmatprep.subr.bf16.mxu1 %v2064_v1 }
 0xeea   :  { %v989_v39 = vpop.f32.mrb[16].mxu1 }
 0xeeb   :  { %v1924_v40 = vadd.f32 %v2204_v45, %v989_v39  ;;  %v1839_v41 = vpop.f32.mrb[17].mxu1 }
 0xeec   :  { %v992_v43 = vpop.f32.mrb[18].mxu1 }
 0xeed   :  { %v995_v46 = vmul.f32 %v1924_v40, %v2154_v17  ;;  %v1840_v47 = vpop.f32.mrb[19].mxu1 }
 0xeef   :  { %2009 = vtanh.f32 %v995_v46 }
 0xef2   :  { %v1097_v49 = vpop.f32.mrb[20].mxu1 }
 0xef3   :  { %v1103_v50 = vadd.f32 %v1097_v49, %v147_v48  ;;  %v1855_v51 = vpop.f32.mrb[21].mxu1 }
 0xef4   :  { %v1100_v52 = vpop.f32.mrb[22].mxu1 }
 0xef5   :  { %v1104_v53 = vmul.f32 %v1103_v50, %v2154_v17  ;;  %v1856_v54 = vpop.f32.mrb[23].mxu1 }
 0xef7   :  { %2011 = vtanh.f32 %v1104_v53 }
 0xef9   :  { %v2010_v55 = vpop.eup %2009 }
 0xefa   :  { %1001 = vrot.lane.b32.xlu0 %v2010_v55, %s2062_s20  ;;  %v997_v57 = vmul.f32 0.5, %v2010_v55 }
 0xefc   :  { %v998_v58 = vadd.f32 0.5, %v997_v57 }
 0xefe   :  { %v999_v0 = vmul.f32 %v998_v58, %v2348_v21 }
 0xf01   :  { %v2012_v56 = vpop.eup %2011 }
 0xf02   :  { %1110 = vrot.lane.b32.xlu1 %v2012_v56, %s2062_s20  ;;  %v1106_v26 = vmul.f32 0.5, %v2012_v56 }
 0xf04   :  { %v1107_v61 = vadd.f32 0.5, %v1106_v26 }
 0xf06   :  { %v1108_v4 = vmul.f32 %v1107_v61, %v2352_v24 }
 0xf6c   :  { %v1002_v59 = vpop.permute.xlu0 %1001 }
 0xf6d   :  { %v1004_v60 = vmul.f32 %v1002_v59, %v998_v58 }
 0xf6f   :  { %1006 = vrot.lane.b32.xlu0 %v1004_v60, %s2068_s0 }
 0xf74   :  { %v1111_v62 = vpop.permute.xlu1 %1110 }
 0xf75   :  { %v1113_v63 = vmul.f32 %v1111_v62, %v1107_v61 }
 0xf77   :  { %1115 = vrot.lane.b32.xlu1 %v1113_v63, %s2068_s0 }
 0xfe1   :  { %v1007_v2 = vpop.permute.xlu0 %1006 }
 0xfe2   :  { %v2390_v3 = vadd.f32 %v1007_v2, %v999_v0 }
 0xfe4   :  { %2013 = vtanh.f32 %v2390_v3 }
 0xfe9   :  { %v1116_v5 = vpop.permute.xlu1 %1115 }
 0xfea   :  { %v2394_v6 = vadd.f32 %v1116_v5, %v1108_v4  ;;  %v148_v4 = vcombine.high %v2161_v27, %v2161_v27 }
 0xfec   :  { %2015 = vtanh.f32 %v2394_v6 }
 0xfee   :  { %v2014_v7 = vpop.eup %2013 }
 0xfef   :  { %1012 = vrot.lane.b32.xlu0 %v2014_v7, %s2062_s20 }
 0xff6   :  { %v2016_v8 = vpop.eup %2015 }
 0xff7   :  { %1121 = vrot.lane.b32.xlu1 %v2016_v8, %s2062_s20 }
0x1061   :  { %v1013_v9 = vpop.permute.xlu0 %1012 }
0x1062   :  { %v1015_v10 = vmul.f32 %v1013_v9, %v998_v58 }
0x1064   :  { %v1016_v11 = vpack.c.bf16 %v1015_v10, %v1015_v10 }
0x1066   :  { %1018 = vrot.lane.b32.xlu0 %v1016_v11, %s2068_s0 }
0x1069   :  { %v1122_v12 = vpop.permute.xlu1 %1121 }
0x106a   :  { %v1124_v15 = vmul.f32 %v1122_v12, %v1107_v61 }
0x106c   :  { %v1125_v16 = vpack.c.bf16 %v1124_v15, %v1124_v15 }
0x106e   :  { %1127 = vrot.lane.b32.xlu1 %v1125_v16, %s2068_s0 }
0x10d8   :  { %v1019_v18 = vpop.permute.xlu0 %1018 }
0x10d9   :  { %1846 = vmatmul.mubr.msk.bf16.vlgmr.msra.gmra.mrb[20].mxu0 %vm219_vm6, %v1019_v18 }
0x10da   :  { %1858 = vmatpush3.bf16.msra.mxu0 %v2168_v36  ;;  %1861 = vmatprep.mubr.msk.bf16.mxu0 %vm2065_vm0, %v2064_v1 }
0x10db   :  { %1859 = vmatprep.subr.bf16.mxu0 %v2064_v1 }
0x10de   :  { %1860 = vmatpush3.bf16.msra.mxu0 %v2174_v37 }
0x10df   :  { %1873 = vmatprep.subr.bf16.mxu0 %v2064_v1 }
0x10e0   :  { %v1128_v19 = vpop.permute.xlu1 %1127 }
0x10e5   :  { %1862 = vmatmul.mubr.msk.bf16.vlgmr.msra.gmra.mrb[20].mxu0 %vm219_vm6, %v1128_v19 }
0x10e6   :  { %1874 = vmatpush3.bf16.msra.mxu0 %v2184_v42  ;;  %1877 = vmatprep.mubr.msk.bf16.mxu0 %vm2065_vm0, %v2064_v1 }
0x10e7   :  { %1875 = vmatprep.subr.bf16.mxu0 %v2064_v1 }
0x10ea   :  { %1876 = vmatpush3.bf16.msra.mxu0 %v2191_v44 }
0x10eb   :  { %1889 = vmatprep.subr.bf16.mxu0 %v2064_v1 }
0x10ed   :  { %1878 = vmatmul.mubr.msk.bf16.vlgmr.msra.gmra.mrb[24].mxu0 %vm219_vm6, %v1128_v19 }
0x10ee   :  { %1890 = vmatpush3.bf16.msra.mxu0 %v2219_v13  ;;  %1893 = vmatprep.mubr.msk.bf16.mxu0 %vm2065_vm0, %v2064_v1 }
0x10ef   :  { %1891 = vmatprep.subr.bf16.mxu0 %v2064_v1 }
0x10f2   :  { %1892 = vmatpush3.bf16.msra.mxu0 %v2223_v14 }
0x10f3   :  { %1905 = vmatprep.subr.bf16.mxu0 %v2064_v1 }
0x11b8   :  { %v1166_v20 = vpop.f32.mrb[20].mxu0 }
0x11b9   :  { %v1925_v21 = vadd.f32 %v2204_v45, %v1166_v20  ;;  %v1863_v22 = vpop.f32.mrb[21].mxu0 }
0x11ba   :  { %v1169_v23 = vpop.f32.mrb[22].mxu0 }
0x11bb   :  { %v1172_v24 = vmul.f32 %v1925_v21, %v2154_v17  ;;  %v1864_v28 = vpop.f32.mrb[23].mxu0 }
0x11bd   :  { %2017 = vtanh.f32 %v1172_v24 }
0x11c0   :  { %v1274_v29 = vpop.f32.mrb[24].mxu0 }
0x11c1   :  { %v1280_v13 = vadd.f32 %v1274_v29, %v2161_v27  ;;  %v1879_v30 = vpop.f32.mrb[25].mxu0 }
0x11c2   :  { %v1277_v31 = vpop.f32.mrb[26].mxu0 }
0x11c3   :  { %v1281_v32 = vmul.f32 %v1280_v13, %v2154_v17  ;;  %v1880_v25 = vpop.f32.mrb[27].mxu0 }
0x11c5   :  { %2019 = vtanh.f32 %v1281_v32 }
0x11c7   :  { %v2018_v14 = vpop.eup %2017 }
0x11c8   :  { %1178 = vrot.lane.b32.xlu0 %v2018_v14, %s2062_s20  ;;  %v1174_v34 = vmul.f32 0.5, %v2018_v14 }
0x11ca   :  { %v1175_v35 = vadd.f32 0.5, %v1174_v34 }
0x11cc   :  { %v1176_v47 = vmul.f32 %v1175_v35, %v2390_v3 }
0x11cf   :  { %v2020_v33 = vpop.eup %2019 }
0x11d0   :  { %1287 = vrot.lane.b32.xlu1 %v2020_v33, %s2062_s20  ;;  %v1283_v40 = vmul.f32 0.5, %v2020_v33 }
0x11d2   :  { %v1284_v41 = vadd.f32 0.5, %v1283_v40 }
0x11d4   :  { %v1285_v50 = vmul.f32 %v1284_v41, %v2394_v6 }
0x123a   :  { %v1179_v38 = vpop.permute.xlu0 %1178 }
0x123b   :  { %v1181_v39 = vmul.f32 %v1179_v38, %v1175_v35 }
0x123d   :  { %1183 = vrot.lane.b32.xlu0 %v1181_v39, %s2068_s0 }
0x1242   :  { %v1288_v43 = vpop.permute.xlu1 %1287 }
0x1243   :  { %v1290_v46 = vmul.f32 %v1288_v43, %v1284_v41 }
0x1245   :  { %1292 = vrot.lane.b32.xlu1 %v1290_v46, %s2068_s0 }
0x12af   :  { %v1184_v48 = vpop.permute.xlu0 %1183 }
0x12b0   :  { %v2431_v49 = vadd.f32 %v1184_v48, %v1176_v47 }
0x12b2   :  { %2021 = vtanh.f32 %v2431_v49 }
0x12b7   :  { %v1293_v51 = vpop.permute.xlu1 %1292 }
0x12b8   :  { %v2435_v52 = vadd.f32 %v1293_v51, %v1285_v50 }
0x12ba   :  { %2023 = vtanh.f32 %v2435_v52 }
0x12bc   :  { %v2022_v53 = vpop.eup %2021 }
0x12bd   :  { %1189 = vrot.lane.b32.xlu0 %v2022_v53, %s2062_s20 }
0x12c4   :  { %v2024_v54 = vpop.eup %2023 }
0x12c5   :  { %1298 = vrot.lane.b32.xlu1 %v2024_v54, %s2062_s20 }
0x132f   :  { %v1190_v55 = vpop.permute.xlu0 %1189 }
0x1330   :  { %v1192_v56 = vmul.f32 %v1190_v55, %v1175_v35 }
0x1332   :  { %v1193_v57 = vpack.c.bf16 %v1192_v56, %v1192_v56 }
0x1334   :  { %1195 = vrot.lane.b32.xlu0 %v1193_v57, %s2068_s0 }
0x1337   :  { %v1299_v58 = vpop.permute.xlu1 %1298 }
0x1338   :  { %v1301_v59 = vmul.f32 %v1299_v58, %v1284_v41 }
0x133a   :  { %v1302_v60 = vpack.c.bf16 %v1301_v59, %v1301_v59 }
0x133c   :  { %1304 = vrot.lane.b32.xlu1 %v1302_v60, %s2068_s0  ;;  %v1656_v60 = vld [vmem:[#allocation2] ss:$0 sm:$0xff] }
0x13a6   :  { %v1196_v26 = vpop.permute.xlu0 %1195 }
0x13a7   :  { %1870 = vmatmul.mubr.msk.bf16.vlgmr.msra.gmra.mrb[24].mxu1 %vm219_vm6, %v1196_v26 }
0x13a8   :  { %1882 = vmatpush3.bf16.msra.mxu1 %v2168_v36  ;;  %1885 = vmatprep.mubr.msk.bf16.mxu1 %vm2065_vm0, %v2064_v1 }
0x13a9   :  { %1883 = vmatprep.subr.bf16.mxu1 %v2064_v1 }
0x13ac   :  { %1884 = vmatpush3.bf16.msra.mxu1 %v2174_v37 }
0x13ad   :  { %1897 = vmatprep.subr.bf16.mxu1 %v2064_v1 }
0x13ae   :  { %v1305_v61 = vpop.permute.xlu1 %1304 }
0x13b3   :  { %1886 = vmatmul.mubr.msk.bf16.vlgmr.msra.gmra.mrb[24].mxu1 %vm219_vm6, %v1305_v61 }
0x13b4   :  { %1898 = vmatpush3.bf16.msra.mxu1 %v2184_v42  ;;  %1901 = vmatprep.mubr.msk.bf16.mxu1 %vm2065_vm0, %v2064_v1 }
0x13b5   :  { %1899 = vmatprep.subr.bf16.mxu1 %v2064_v1 }
0x13b8   :  { %1900 = vmatpush3.bf16.msra.mxu1 %v2191_v44 }
0x13b9   :  { %1913 = vmatprep.subr.bf16.mxu1 %v2064_v1 }
0x13bb   :  { %1902 = vmatmul.mubr.msk.bf16.vlgmr.msra.gmra.mrb[28].mxu1 %vm219_vm6, %v1305_v61 }
0x13bc   :  { %1917 = vmatprep.mubr.msk.bf16.mxu1 %vm2065_vm0, %v2064_v1 }
0x1486   :  { %v1343_v62 = vpop.f32.mrb[24].mxu1 }
0x1487   :  { %v1926_v63 = vadd.f32 %v2204_v45, %v1343_v62  ;;  %v1887_v0 = vpop.f32.mrb[25].mxu1 }
0x1488   :  { %v1346_v2 = vpop.f32.mrb[26].mxu1 }
0x1489   :  { %v1349_v42 = vmul.f32 %v1926_v63, %v2154_v17  ;;  %v1888_v3 = vpop.f32.mrb[27].mxu1 }
0x148b   :  { %2025 = vtanh.f32 %v1349_v42 }
0x148e   :  { %v1451_v44 = vpop.f32.mrb[28].mxu1 }
0x148f   :  { %v1457_v5 = vadd.f32 %v1451_v44, %v148_v4  ;;  %v1903_v6 = vpop.f32.mrb[29].mxu1 }
0x1490   :  { %v1454_v7 = vpop.f32.mrb[30].mxu1 }
0x1491   :  { %v1458_v8 = vmul.f32 %v1457_v5, %v2154_v17  ;;  %v1904_v9 = vpop.f32.mrb[31].mxu1 }
0x1493   :  { %2027 = vtanh.f32 %v1458_v8 }
0x1495   :  { %v2026_v10 = vpop.eup %2025 }
0x1496   :  { %1355 = vrot.lane.b32.xlu0 %v2026_v10, %s2062_s20  ;;  %v1351_v12 = vmul.f32 0.5, %v2026_v10 }
0x1498   :  { %v1352_v15 = vadd.f32 0.5, %v1351_v12 }
0x149a   :  { %v1353_v22 = vmul.f32 %v1352_v15, %v2431_v49 }
0x149d   :  { %v2028_v11 = vpop.eup %2027 }
0x149e   :  { %1464 = vrot.lane.b32.xlu1 %v2028_v11, %s2062_s20  ;;  %v1460_v27 = vmul.f32 0.5, %v2028_v11 }
0x14a0   :  { %v1461_v19 = vadd.f32 0.5, %v1460_v27 }
0x14a2   :  { %v1462_v28 = vmul.f32 %v1461_v19, %v2435_v52 }
0x1508   :  { %v1356_v16 = vpop.permute.xlu0 %1355 }
0x1509   :  { %v1358_v18 = vmul.f32 %v1356_v16, %v1352_v15 }
0x150b   :  { %1360 = vrot.lane.b32.xlu0 %v1358_v18, %s2068_s0 }
0x1510   :  { %v1465_v20 = vpop.permute.xlu1 %1464 }
0x1511   :  { %v1467_v21 = vmul.f32 %v1465_v20, %v1461_v19 }
0x1513   :  { %1469 = vrot.lane.b32.xlu1 %v1467_v21, %s2068_s0 }
0x157d   :  { %v1361_v23 = vpop.permute.xlu0 %1360 }
0x157e   :  { %v1363_v24 = vadd.f32 %v1361_v23, %v1353_v22 }
0x1580   :  { %2029 = vtanh.f32 %v1363_v24 }
0x1585   :  { %v1470_v29 = vpop.permute.xlu1 %1469 }
0x1586   :  { %v1472_v13 = vadd.f32 %v1470_v29, %v1462_v28 }
0x1588   :  { %2031 = vtanh.f32 %v1472_v13 }
0x158a   :  { %v2030_v30 = vpop.eup %2029 }
0x158b   :  { %1366 = vrot.lane.b32.xlu0 %v2030_v30, %s2062_s20 }
0x1592   :  { %v2032_v31 = vpop.eup %2031 }
0x1593   :  { %1475 = vrot.lane.b32.xlu1 %v2032_v31, %s2062_s20 }
0x15fd   :  { %v1367_v32 = vpop.permute.xlu0 %1366 }
0x15fe   :  { %v1369_v25 = vmul.f32 %v1367_v32, %v1352_v15 }
0x1600   :  { %v1370_v14 = vpack.c.bf16 %v1369_v25, %v1369_v25 }
0x1602   :  { %1372 = vrot.lane.b32.xlu0 %v1370_v14, %s2068_s0 }
0x1605   :  { %v1476_v33 = vpop.permute.xlu1 %1475 }
0x1606   :  { %v1478_v34 = vmul.f32 %v1476_v33, %v1461_v19 }
0x1608   :  { %v1479_v35 = vpack.c.bf16 %v1478_v34, %v1478_v34 }
0x160a   :  { %1481 = vrot.lane.b32.xlu1 %v1479_v35, %s2068_s0 }
0x1674   :  { %v1373_v38 = vpop.permute.xlu0 %1372 }
0x1675   :  { %1894 = vmatmul.mubr.msk.bf16.vlgmr.msra.gmra.mrb[28].mxu0 %vm219_vm6, %v1373_v38 }
0x1676   :  { %1906 = vmatpush3.bf16.msra.mxu0 %v2168_v36  ;;  %1909 = vmatprep.mubr.msk.bf16.mxu0 %vm2065_vm0, %v2064_v1 }
0x1677   :  { %1907 = vmatprep.subr.bf16.mxu0 %v2064_v1 }
0x167a   :  { %1908 = vmatpush3.bf16.msra.mxu0 %v2174_v37 }
0x167c   :  { %v1482_v39 = vpop.permute.xlu1 %1481 }
0x1681   :  { %1910 = vmatmul.mubr.msk.bf16.vlgmr.msra.gmra.mrb[28].mxu0 %vm219_vm6, %v1482_v39 }
0x1754   :  { %v1520_v40 = vpop.f32.mrb[28].mxu0 }
0x1755   :  { %v1927_v41 = vadd.f32 %v2204_v45, %v1520_v40  ;;  %v1911_v43 = vpop.f32.mrb[29].mxu0  ;;  %v1971_v45 = vld [vmem:[%s2505_s7] sm:$0xff]  }
0x1756   :  { %v1523_v46 = vpop.f32.mrb[30].mxu0  ;;  %1914 = vmatpush3.bf16.msra.mxu1 %v1971_v45 }
0x1757   :  { %v1526_v47 = vmul.f32 %v1927_v41, %v2154_v17  ;;  %v1912_v48 = vpop.f32.mrb[31].mxu0  ;;  %v1972_v17 = vld [vmem:[%s2505_s7 + $0x8] sm:$0xff]   ;;  %1915 = vmatprep.subr.bf16.mxu1 %v2064_v1 }
0x1759   :  { %2033 = vtanh.f32 %v1526_v47 }
0x175a   :  { %1916 = vmatpush3.bf16.msra.mxu1 %v1972_v17 }
0x1763   :  { %v2034_v36 = vpop.eup %2033 }
0x1764   :  { %1532 = vrot.lane.b32.xlu0 %v2034_v36, %s2062_s20  ;;  %v1528_v49 = vmul.f32 0.5, %v2034_v36 }
0x1766   :  { %v1529_v50 = vadd.f32 0.5, %v1528_v49 }
0x1768   :  { %v1530_v37 = vmul.f32 %v1529_v50, %v1363_v24 }
0x17d6   :  { %v1533_v51 = vpop.permute.xlu0 %1532 }
0x17d7   :  { %v1535_v52 = vmul.f32 %v1533_v51, %v1529_v50 }
0x17d9   :  { %1537 = vrot.lane.b32.xlu1 %v1535_v52, %s2068_s0 }
0x184b   :  { %v1538_v53 = vpop.permute.xlu1 %1537 }
0x184c   :  { %v1540_v54 = vadd.f32 %v1538_v53, %v1530_v37 }
0x184e   :  { %2035 = vtanh.f32 %v1540_v54 }
0x1858   :  { %v2036_v55 = vpop.eup %2035 }
0x1859   :  { %1543 = vrot.lane.b32.xlu0 %v2036_v55, %s2062_s20 }
0x18cb   :  { %v1544_v56 = vpop.permute.xlu0 %1543 }
0x18cc   :  { %v1546_v57 = vmul.f32 %v1544_v56, %v1529_v50 }
0x18ce   :  { %v1547_v58 = vpack.c.bf16 %v1546_v57, %v1546_v57 }
0x18d0   :  { %1560 = vrot.lane.b32.xlu1 %v1547_v58, %s2068_s0 }
0x1942   :  { %v1561_v59 = vpop.permute.xlu1 %1560 }
0x1943   :  { %1918 = vmatmul.mubr.msk.bf16.vlgmr.msra.gmra.mrb[32].mxu1 %vm219_vm6, %v1561_v59 }
0x1a16   :  { %v1611_v26 = vpop.f32.mrb[32].mxu1 }
0x1a17   :  { %v1612_v61 = vadd.f32 %v1656_v60, %v1611_v26  ;;  %v1919_v62 = vpop.f32.mrb[33].mxu1 }
0x1a18   :  { %v1614_v63 = vpop.f32.mrb[34].mxu1 }
0x1a19   :  { %1618 = vst.msk [vmem:[%s2507_s9] sm:$0x3] %vm1617_vm7, %v1612_v61  ;;  %v1920_v1 = vpop.f32.mrb[35].mxu1 }
0x1a1a   :  { %1623 = vsyncpa [#allocation4], 1 }

</bundles_post_ra>
